<compile_context>
chip_gen: v7x
topology: tpu7x:2x2x1
jax: 0.10.0
libtpu: 0.0.40
codegen_flags: <defaults>
</compile_context>

<pallas_src>
import functools

import jax
import jax.numpy as jnp
from jax import lax
from jax.experimental import pallas as pl
from jax.experimental.pallas import tpu as pltpu


def _round_up(x, m):
    return ((x + m - 1) // m) * m


def _decoder_core_kernel(
    featT_ref,      # (Bp, E, Ppad)  f32  features, pixel axis lane-minor
    att1_ref,       # (Bp, A, Ppad)  f32  feat@W_ea^T + b_ea + b_da, lane-minor
    pix_mask_ref,   # (1, Ppad)      f32  +b_fa on real pixels, -1e30 on pads
    emb_ref,        # (T, Bp, 4D)    f32  emb_t@W_ih_e^T + b_ih + b_hh
    len_ref,        # (Bp, 1)        i32  decode lengths (0 for padded rows)
    w_fa_ref,       # (A, 1)         f32
    w_hf_ref,       # (D, HF)        f32  fused [w_da.T | w_fb.T | w_hh.T]
    b_fb_ref,       # (1, E)         f32
    w_ih_a_ref,     # (E, 4D)        f32
    h0_ref,         # (Bp, D)        f32
    c0_ref,         # (Bp, D)        f32
    h_out_ref,      # (T, Bp, D)     f32
    alpha_out_ref,  # (T, Bp, Ppad)  f32
    *, off_fb, off_hh,
):
    A = att1_ref.shape[1]
    E = featT_ref.shape[1]
    D = h0_ref.shape[1]
    T = emb_ref.shape[0]

    def step(t, carry):
        h, c = carry

        # --- single fused matmul for everything with h as LHS ---
        hW = jnp.dot(h, w_hf_ref[...], preferred_element_type=jnp.float32)   # (Bp, HF)
        att2 = hW[:, 0:A]                                                    # decoder_att(h)
        gate = jax.nn.sigmoid(hW[:, off_fb:off_fb + E] + b_fb_ref[...])      # sigmoid(f_beta(h))
        h_gates = hW[:, off_hh:off_hh + 4 * D]                               # h @ w_hh.T

        # --- attention scores, lane-dense over pixels ---
        e = jnp.maximum(att1_ref[...] + att2[:, :, None], 0.0)               # (Bp, A, Ppad)
        att = jnp.sum(e * w_fa_ref[...][None, :, :], axis=1)                 # (Bp, Ppad)
        att = att + pix_mask_ref[...]                                        # +b_fa / -1e30 pads

        # softmax over pixels (numerically stable); reciprocal on the EUP slot
        att_max = jnp.max(att, axis=-1, keepdims=True)
        exp_att = jnp.exp(att - att_max)
        denom = jnp.sum(exp_att, axis=-1, keepdims=True)
        alpha = exp_att * pl.reciprocal(denom, approx=True)                  # (Bp, Ppad)

        # attention-weighted encoding: lane reduce over Ppad, then gating
        awe = jnp.sum(featT_ref[...] * alpha[:, None, :], axis=-1)           # (Bp, E)
        awe = gate * awe

        # --- LSTMCell on concat([emb_t, awe]) ---
        gates = (emb_ref[t]
                 + jnp.dot(awe, w_ih_a_ref[...], preferred_element_type=jnp.float32)
                 + h_gates)                                                  # (Bp, 4D)
        i_g = jax.nn.sigmoid(gates[:, 0:D])
        f_g = jax.nn.sigmoid(gates[:, D:2 * D])
        g_g = jnp.tanh(gates[:, 2 * D:3 * D])
        o_g = jax.nn.sigmoid(gates[:, 3 * D:4 * D])
        c_new = f_g * c + i_g * g_g
        h_new = o_g * jnp.tanh(c_new)

        # batch_size_t truncation as a per-row mask (decode_length > t)
        active = len_ref[...] > t                                            # (Bp, 1) bool
        h_upd = jnp.where(active, h_new, h)
        c_upd = jnp.where(active, c_new, c)

        h_out_ref[t] = h_upd
        alpha_out_ref[t] = jnp.where(active, alpha, 0.0)
        return (h_upd, c_upd)

    lax.fori_loop(0, T, step, (h0_ref[...], c0_ref[...]))


def init_params(key, *, attention_dim, decoder_dim, encoder_dim, embed_size, vocab_size):
    """Deterministic parameter init mirroring DecoderRNN.__init__ shapes."""
    def lin(k, out_f, in_f):
        k1, k2 = jax.random.split(k)
        bound = 1.0 / (in_f ** 0.5)
        w = jax.random.uniform(k1, (out_f, in_f), jnp.float32, -bound, bound)
        b = jax.random.uniform(k2, (out_f,), jnp.float32, -bound, bound)
        return w, b

    keys = jax.random.split(key, 12)
    params = {
        "init_h": lin(keys[0], decoder_dim, encoder_dim),        # (D, E)
        "init_c": lin(keys[1], decoder_dim, encoder_dim),        # (D, E)
        "f_beta": lin(keys[2], encoder_dim, decoder_dim),        # (E, D)
        "fc": lin(keys[3], vocab_size, decoder_dim),             # (V, D)
        "encoder_att": lin(keys[4], attention_dim, encoder_dim), # (A, E)
        "decoder_att": lin(keys[5], attention_dim, decoder_dim), # (A, D)
        "full_att": lin(keys[6], 1, attention_dim),              # (1, A)
        "embed": jax.random.normal(keys[7], (vocab_size, embed_size), jnp.float32),
    }
    bound = 1.0 / (decoder_dim ** 0.5)
    params["w_ih"] = jax.random.uniform(
        keys[8], (4 * decoder_dim, embed_size + encoder_dim), jnp.float32, -bound, bound)
    params["b_ih"] = jax.random.uniform(keys[9], (4 * decoder_dim,), jnp.float32, -bound, bound)
    params["w_hh"] = jax.random.uniform(
        keys[10], (4 * decoder_dim, decoder_dim), jnp.float32, -bound, bound)
    params["b_hh"] = jax.random.uniform(keys[11], (4 * decoder_dim,), jnp.float32, -bound, bound)
    return params


def decoder_rnn_forward(features, captions, lengths, params):
    """Equivalent of DecoderRNN.forward(features, captions, lengths) for lengths != 0."""
    f32 = jnp.float32
    B, P, E = features.shape
    embed = params["embed"].shape[1]
    D = params["init_h"][0].shape[0]
    A = params["decoder_att"][0].shape[0]

    decode_lengths = [int(l) - 1 for l in lengths]
    if min(decode_lengths) < 1:
        raise ValueError("all lengths must be >= 2 (decode_lengths >= 1)")
    T = max(decode_lengths)

    Bp = _round_up(B, 8)        # sublane-full batch tiles
    Ppad = _round_up(P, 128)    # lane-dense pixel axis

    feat = features.astype(f32)
    feat_p = jnp.zeros((Bp, Ppad, E), f32).at[:B, :P, :].set(feat)
    featT_p = jnp.transpose(feat_p, (0, 2, 1))                       # (Bp, E, Ppad)

    # ---- hoisted, time-invariant computations (batched, MXU-efficient) ----
    w_ea, b_ea = params["encoder_att"]
    w_da, b_da = params["decoder_att"]
    w_fa, b_fa = params["full_att"]
    w_fb, b_fb = params["f_beta"]
    w_fc, b_fc = params["fc"]
    w_h0, b_h0 = params["init_h"]
    w_c0, b_c0 = params["init_c"]
    w_hh = params["w_hh"]

    # encoder-side attention projection with b_ea AND b_da folded in; lane-dense.
    att1 = jnp.einsum("bpe,ae->bpa", feat_p, w_ea) + (b_ea + b_da)   # (Bp, Ppad, A)
    att1T = jnp.transpose(att1, (0, 2, 1))                            # (Bp, A, Ppad)

    mean_feat = jnp.mean(feat, axis=1)                                # over REAL pixels
    h0 = mean_feat @ w_h0.T + b_h0
    c0 = mean_feat @ w_c0.T + b_c0
    h0_p = jnp.zeros((Bp, D), f32).at[:B].set(h0)
    c0_p = jnp.zeros((Bp, D), f32).at[:B].set(c0)

    # Embedding lookup + embedding-side LSTM gate partial, one big matmul.
    embeddings = params["embed"][captions[:, :T]]                     # (B, T, embed)
    w_ih = params["w_ih"]                                             # (4D, embed+E)
    w_ih_e = w_ih[:, :embed]
    w_ih_a = w_ih[:, embed:]
    b_gate = params["b_ih"] + params["b_hh"]
    emb_part = jnp.einsum("bte,ge->btg", embeddings, w_ih_e) + b_gate  # (B, T, 4D)
    emb_part_p = jnp.zeros((T, Bp, 4 * D), f32).at[:, :B, :].set(
        jnp.transpose(emb_part, (1, 0, 2)))

    dec_len = jnp.zeros((Bp, 1), jnp.int32).at[:B, 0].set(
        jnp.asarray(decode_lengths, jnp.int32))
    pix_mask = jnp.where(jnp.arange(Ppad) < P, b_fa[0], -1e30).astype(f32).reshape(1, Ppad)

    # fused h-LHS weight: [w_da.T | w_fb.T | w_hh.T] with 128-lane-aligned segments
    A_pad = _round_up(A, 128)
    E_pad = _round_up(E, 128)
    off_fb = A_pad
    off_hh = A_pad + E_pad
    HF = off_hh + 4 * D
    w_hfused = jnp.zeros((D, HF), f32)
    w_hfused = w_hfused.at[:, :A].set(w_da.T)
    w_hfused = w_hfused.at[:, off_fb:off_fb + E].set(w_fb.T)
    w_hfused = w_hfused.at[:, off_hh:off_hh + 4 * D].set(w_hh.T)

    inputs = [
        featT_p,                 # 0
        att1T,                   # 1
        pix_mask,                # 2
        emb_part_p,              # 3
        dec_len,                 # 4
        w_fa.reshape(A, 1),      # 5
        w_hfused,                # 6
        b_fb.reshape(1, E),      # 7
        w_ih_a.T,                # 8  (E, 4D)
        h0_p,                    # 9
        c0_p,                    # 10
    ]

    kernel = functools.partial(_decoder_core_kernel, off_fb=off_fb, off_hh=off_hh)
    vmem_spec = pl.BlockSpec(memory_space=pltpu.MemorySpace.VMEM)

    # Single kernel invocation (no grid); everything is VMEM-resident at these
    # sizes.  NOTE: for production sizes, raise vmem_limit_bytes per generation
    # and/or switch the large residents to bf16 storage.
    h_tm, alpha_tm = pl.pallas_call(
        kernel,
        out_shape=(jax.ShapeDtypeStruct((T, Bp, D), f32),
                   jax.ShapeDtypeStruct((T, Bp, Ppad), f32)),
        in_specs=[vmem_spec] * len(inputs),
        out_specs=(vmem_spec, vmem_spec),
    )(*inputs)

    # ---- hoisted fc projection: one (T*B, D) @ (D, V) matmul ----
    h_seq = h_tm[:, :B, :]                                            # (T, B, D)
    dl = jnp.asarray(decode_lengths)
    tmask = jnp.arange(T)[:, None] < dl[None, :]                      # (T, B)
    preds_tm = jnp.einsum("tbd,vd->tbv", h_seq, w_fc) + b_fc
    preds_tm = jnp.where(tmask[:, :, None], preds_tm, 0.0)

    predictions = jnp.transpose(preds_tm, (1, 0, 2))                  # (B, T, V)
    alphas = jnp.transpose(alpha_tm[:, :B, :P], (1, 0, 2))            # (B, T, P)
    return predictions, captions, decode_lengths, alphas


def _reference_forward(features, captions, lengths, params):
    """Pure-JAX replica of the PyTorch forward (lengths != 0 branch), for checking."""
    B, P, E = features.shape
    w_ea, b_ea = params["encoder_att"]
    w_da, b_da = params["decoder_att"]
    w_fa, b_fa = params["full_att"]
    w_fb, b_fb = params["f_beta"]
    w_fc, b_fc = params["fc"]
    w_h0, b_h0 = params["init_h"]
    w_c0, b_c0 = params["init_c"]
    w_ih, b_ih = params["w_ih"], params["b_ih"]
    w_hh, b_hh = params["w_hh"], params["b_hh"]
    D = w_h0.shape[0]
    V = w_fc.shape[0]
    decode_lengths = [int(l) - 1 for l in lengths]
    T = max(decode_lengths)
    dl = jnp.asarray(decode_lengths)

    emb = params["embed"][captions]
    h = features.mean(axis=1) @ w_h0.T + b_h0
    c = features.mean(axis=1) @ w_c0.T + b_c0
    preds_all = jnp.zeros((B, T, V), jnp.float32)
    alphas_all = jnp.zeros((B, T, P), jnp.float32)
    for t in range(T):
        active = (dl > t)[:, None]
        att1 = features @ w_ea.T + b_ea
        att2 = h @ w_da.T + b_da
        e = jnp.maximum(att1 + att2[:, None, :], 0.0)
        att = e @ w_fa[0] + b_fa[0]
        alpha = jax.nn.softmax(att, axis=1)
        awe = (features * alpha[:, :, None]).sum(axis=1)
        gate = jax.nn.sigmoid(h @ w_fb.T + b_fb)
        awe = gate * awe
        x = jnp.concatenate([emb[:, t, :], awe], axis=1)
        gates = x @ w_ih.T + b_ih + h @ w_hh.T + b_hh
        i_g = jax.nn.sigmoid(gates[:, :D])
        f_g = jax.nn.sigmoid(gates[:, D:2 * D])
        g_g = jnp.tanh(gates[:, 2 * D:3 * D])
        o_g = jax.nn.sigmoid(gates[:, 3 * D:])
        c_new = f_g * c + i_g * g_g
        h_new = o_g * jnp.tanh(c_new)
        h = jnp.where(active, h_new, h)
        c = jnp.where(active, c_new, c)
        preds = h_new @ w_fc.T + b_fc
        preds_all = preds_all.at[:, t, :].set(jnp.where(active, preds, 0.0))
        alphas_all = alphas_all.at[:, t, :].set(jnp.where(active, alpha, 0.0))
    return preds_all, alphas_all


if __name__ == "__main__":
    key = jax.random.PRNGKey(0)
    attention_dim = 32
    decoder_dim = 128          # multiple of 128 -> lane-aligned i/f/g/o gate slices
    encoder_dim = 32
    embed_size = 32
    vocab_size = 64
    B, P = 4, 16               # batch, num_pixels (4x4 feature map flattened)

    kp, kf, kc = jax.random.split(key, 3)
    params = init_params(kp, attention_dim=attention_dim, decoder_dim=decoder_dim,
                         encoder_dim=encoder_dim, embed_size=embed_size,
                         vocab_size=vocab_size)

    features = jax.random.normal(kf, (B, P, encoder_dim), jnp.float32)
    lengths = [8, 7, 6, 5]     # sorted descending, as the PyTorch loop assumes
    captions = jax.random.randint(kc, (B, max(lengths)), 0, vocab_size, dtype=jnp.int32)

    predictions, caps, dec_lens, alphas = decoder_rnn_forward(features, captions, lengths, params)
    jax.block_until_ready((predictions, alphas))

    T = max(dec_lens)
    assert predictions.shape == (B, T, vocab_size)
    assert alphas.shape == (B, T, P)
    assert bool(jnp.all(jnp.isfinite(predictions)))

    ref_preds, ref_alphas = _reference_forward(features, captions, lengths, params)
    assert bool(jnp.allclose(predictions, ref_preds, rtol=2e-2, atol=2e-2)), \
        float(jnp.max(jnp.abs(predictions - ref_preds)))
    assert bool(jnp.allclose(alphas, ref_alphas, rtol=2e-2, atol=2e-2)), \
        float(jnp.max(jnp.abs(alphas - ref_alphas)))

    print("KERNEL_OK")
</pallas_src>

<mosaic_0001>
module attributes {stable_mosaic.version = 11 : i64} {
  func.func @_decoder_core_kernel(%arg0: memref<8x32x128xf32, #tpu.memory_space<vmem>>, %arg1: memref<8x32x128xf32, #tpu.memory_space<vmem>>, %arg2: memref<1x128xf32, #tpu.memory_space<vmem>>, %arg3: memref<7x8x512xf32, #tpu.memory_space<vmem>>, %arg4: memref<8x1xi32, #tpu.memory_space<vmem>>, %arg5: memref<32x1xf32, #tpu.memory_space<vmem>>, %arg6: memref<128x768xf32, #tpu.memory_space<vmem>>, %arg7: memref<1x32xf32, #tpu.memory_space<vmem>>, %arg8: memref<32x512xf32, #tpu.memory_space<vmem>>, %arg9: memref<8x128xf32, #tpu.memory_space<vmem>>, %arg10: memref<8x128xf32, #tpu.memory_space<vmem>>, %arg11: memref<7x8x128xf32, #tpu.memory_space<vmem>>, %arg12: memref<7x8x128xf32, #tpu.memory_space<vmem>>) attributes {dimension_semantics = [], scalar_prefetch = 0 : i64, scratch_operands = 0 : i64, tpu.core_type = #tpu.core_type<tc>} {
    %c0 = arith.constant 0 : index
    %c0_0 = arith.constant 0 : index
    %0 = vector.load %arg9[%c0, %c0_0] : memref<8x128xf32, #tpu.memory_space<vmem>>, vector<8x128xf32>
    %c0_1 = arith.constant 0 : index
    %c0_2 = arith.constant 0 : index
    %1 = vector.load %arg10[%c0_1, %c0_2] : memref<8x128xf32, #tpu.memory_space<vmem>>, vector<8x128xf32>
    %c0_i32 = arith.constant 0 : i32
    %c7_i32 = arith.constant 7 : i32
    %2 = arith.addi %c0_i32, %c7_i32 : i32
    %c1_i32 = arith.constant 1 : i32
    %3:2 = scf.for %arg13 = %c0_i32 to %2 step %c1_i32 iter_args(%arg14 = %0, %arg15 = %1) -> (vector<8x128xf32>, vector<8x128xf32>)  : i32 {
      %c0_4 = arith.constant 0 : index
      %c0_5 = arith.constant 0 : index
      %4 = vector.load %arg6[%c0_4, %c0_5] : memref<128x768xf32, #tpu.memory_space<vmem>>, vector<128x768xf32>
      %cst = arith.constant dense<0.000000e+00> : vector<8x768xf32>
      %5 = tpu.matmul %arg14, %4, %cst {dimension_numbers = #tpu.dot_dimension_numbers<[1], [0], [0], [1], [0, 0, 1, 1], [], []>} : vector<8x128xf32>, vector<128x768xf32>, vector<8x768xf32> -> vector<8x768xf32>
      %6 = vector.extract_strided_slice %5 {offsets = [0, 0], sizes = [8, 32], strides = [1, 1]} : vector<8x768xf32> to vector<8x32xf32>
      %7 = vector.extract_strided_slice %5 {offsets = [0, 128], sizes = [8, 32], strides = [1, 1]} : vector<8x768xf32> to vector<8x32xf32>
      %c0_6 = arith.constant 0 : index
      %c0_7 = arith.constant 0 : index
      %8 = vector.load %arg7[%c0_6, %c0_7] : memref<1x32xf32, #tpu.memory_space<vmem>>, vector<1x32xf32>
      %9 = vector.broadcast %8 : vector<1x32xf32> to vector<8x32xf32>
      %10 = arith.addf %7, %9 : vector<8x32xf32>
      %11 = arith.negf %10 : vector<8x32xf32>
      %12 = math.exp %11 : vector<8x32xf32>
      %cst_8 = arith.constant 1.000000e+00 : f32
      %13 = vector.broadcast %cst_8 : f32 to vector<8x32xf32>
      %14 = arith.addf %13, %12 : vector<8x32xf32>
      %15 = arith.divf %13, %14 : vector<8x32xf32>
      %16 = vector.extract_strided_slice %5 {offsets = [0, 256], sizes = [8, 512], strides = [1, 1]} : vector<8x768xf32> to vector<8x512xf32>
      %c0_9 = arith.constant 0 : index
      %c0_10 = arith.constant 0 : index
      %c0_11 = arith.constant 0 : index
      %17 = vector.load %arg1[%c0_9, %c0_10, %c0_11] : memref<8x32x128xf32, #tpu.memory_space<vmem>>, vector<8x32x128xf32>
      %18 = vector.shape_cast %6 : vector<8x32xf32> to vector<8x32x1xf32>
      %19 = vector.broadcast %18 : vector<8x32x1xf32> to vector<8x32x128xf32>
      %20 = arith.addf %17, %19 : vector<8x32x128xf32>
      %cst_12 = arith.constant 0.000000e+00 : f32
      %21 = vector.broadcast %cst_12 : f32 to vector<8x32x128xf32>
      %22 = arith.maximumf %20, %21 : vector<8x32x128xf32>
      %c0_13 = arith.constant 0 : index
      %c0_14 = arith.constant 0 : index
      %23 = vector.load %arg5[%c0_13, %c0_14] : memref<32x1xf32, #tpu.memory_space<vmem>>, vector<32x1xf32>
      %24 = vector.shape_cast %23 : vector<32x1xf32> to vector<1x32x1xf32>
      %25 = vector.broadcast %24 : vector<1x32x1xf32> to vector<8x32x128xf32>
      %26 = arith.mulf %22, %25 : vector<8x32x128xf32>
      %cst_15 = arith.constant dense<0.000000e+00> : vector<8x128xf32>
      %27 = vector.multi_reduction <add>, %26, %cst_15 [1] : vector<8x32x128xf32> to vector<8x128xf32>
      %c0_16 = arith.constant 0 : index
      %c0_17 = arith.constant 0 : index
      %28 = vector.load %arg2[%c0_16, %c0_17] : memref<1x128xf32, #tpu.memory_space<vmem>>, vector<1x128xf32>
      %29 = vector.broadcast %28 : vector<1x128xf32> to vector<8x128xf32>
      %30 = arith.addf %27, %29 : vector<8x128xf32>
      %cst_18 = arith.constant dense<0xFF800000> : vector<8xf32>
      %31 = vector.multi_reduction <maximumf>, %30, %cst_18 [1] : vector<8x128xf32> to vector<8xf32>
      %32 = vector.shape_cast %31 : vector<8xf32> to vector<8x1xf32>
      %33 = vector.broadcast %32 : vector<8x1xf32> to vector<8x128xf32>
      %34 = arith.subf %30, %33 : vector<8x128xf32>
      %35 = math.exp %34 : vector<8x128xf32>
      %cst_19 = arith.constant dense<0.000000e+00> : vector<8xf32>
      %36 = vector.multi_reduction <add>, %35, %cst_19 [1] : vector<8x128xf32> to vector<8xf32>
      %37 = vector.shape_cast %36 : vector<8xf32> to vector<8x1xf32>
      %38 = tpu.reciprocal %37 {approx = true} : vector<8x1xf32> -> vector<8x1xf32>
      %39 = vector.broadcast %38 : vector<8x1xf32> to vector<8x128xf32>
      %40 = arith.mulf %35, %39 : vector<8x128xf32>
      %c0_20 = arith.constant 0 : index
      %c0_21 = arith.constant 0 : index
      %c0_22 = arith.constant 0 : index
      %41 = vector.load %arg0[%c0_20, %c0_21, %c0_22] : memref<8x32x128xf32, #tpu.memory_space<vmem>>, vector<8x32x128xf32>
      %42 = vector.shape_cast %40 : vector<8x128xf32> to vector<8x1x128xf32>
      %43 = vector.broadcast %42 : vector<8x1x128xf32> to vector<8x32x128xf32>
      %44 = arith.mulf %41, %43 : vector<8x32x128xf32>
      %cst_23 = arith.constant dense<0.000000e+00> : vector<8x32xf32>
      %45 = vector.multi_reduction <add>, %44, %cst_23 [2] : vector<8x32x128xf32> to vector<8x32xf32>
      %46 = arith.mulf %15, %45 : vector<8x32xf32>
      %47 = arith.index_cast %arg13 : i32 to index
      %c0_24 = arith.constant 0 : index
      %c0_25 = arith.constant 0 : index
      %48 = vector.load %arg3[%47, %c0_24, %c0_25] : memref<7x8x512xf32, #tpu.memory_space<vmem>>, vector<1x8x512xf32>
      %49 = vector.shape_cast %48 : vector<1x8x512xf32> to vector<8x512xf32>
      %c0_26 = arith.constant 0 : index
      %c0_27 = arith.constant 0 : index
      %50 = vector.load %arg8[%c0_26, %c0_27] : memref<32x512xf32, #tpu.memory_space<vmem>>, vector<32x512xf32>
      %cst_28 = arith.constant dense<0.000000e+00> : vector<8x512xf32>
      %51 = tpu.matmul %46, %50, %cst_28 {dimension_numbers = #tpu.dot_dimension_numbers<[1], [0], [0], [1], [0, 0, 1, 1], [], []>} : vector<8x32xf32>, vector<32x512xf32>, vector<8x512xf32> -> vector<8x512xf32>
      %52 = arith.addf %49, %51 : vector<8x512xf32>
      %53 = arith.addf %52, %16 : vector<8x512xf32>
      %54 = vector.extract_strided_slice %53 {offsets = [0, 0], sizes = [8, 128], strides = [1, 1]} : vector<8x512xf32> to vector<8x128xf32>
      %55 = arith.negf %54 : vector<8x128xf32>
      %56 = math.exp %55 : vector<8x128xf32>
      %cst_29 = arith.constant 1.000000e+00 : f32
      %57 = vector.broadcast %cst_29 : f32 to vector<8x128xf32>
      %58 = arith.addf %57, %56 : vector<8x128xf32>
      %59 = arith.divf %57, %58 : vector<8x128xf32>
      %60 = vector.extract_strided_slice %53 {offsets = [0, 128], sizes = [8, 128], strides = [1, 1]} : vector<8x512xf32> to vector<8x128xf32>
      %61 = arith.negf %60 : vector<8x128xf32>
      %62 = math.exp %61 : vector<8x128xf32>
      %cst_30 = arith.constant 1.000000e+00 : f32
      %63 = vector.broadcast %cst_30 : f32 to vector<8x128xf32>
      %64 = arith.addf %63, %62 : vector<8x128xf32>
      %65 = arith.divf %63, %64 : vector<8x128xf32>
      %66 = vector.extract_strided_slice %53 {offsets = [0, 256], sizes = [8, 128], strides = [1, 1]} : vector<8x512xf32> to vector<8x128xf32>
      %67 = math.tanh %66 : vector<8x128xf32>
      %68 = vector.extract_strided_slice %53 {offsets = [0, 384], sizes = [8, 128], strides = [1, 1]} : vector<8x512xf32> to vector<8x128xf32>
      %69 = arith.negf %68 : vector<8x128xf32>
      %70 = math.exp %69 : vector<8x128xf32>
      %cst_31 = arith.constant 1.000000e+00 : f32
      %71 = vector.broadcast %cst_31 : f32 to vector<8x128xf32>
      %72 = arith.addf %71, %70 : vector<8x128xf32>
      %73 = arith.divf %71, %72 : vector<8x128xf32>
      %74 = arith.mulf %65, %arg15 : vector<8x128xf32>
      %75 = arith.mulf %59, %67 : vector<8x128xf32>
      %76 = arith.addf %74, %75 : vector<8x128xf32>
      %77 = math.tanh %76 : vector<8x128xf32>
      %78 = arith.mulf %73, %77 : vector<8x128xf32>
      %c0_32 = arith.constant 0 : index
      %c0_33 = arith.constant 0 : index
      %79 = vector.load %arg4[%c0_32, %c0_33] : memref<8x1xi32, #tpu.memory_space<vmem>>, vector<8x1xi32>
      %80 = vector.broadcast %arg13 : i32 to vector<8x1xi32>
      %81 = arith.cmpi sgt, %79, %80 : vector<8x1xi32>
      %82 = vector.shape_cast %81 : vector<8x1xi1> to vector<8x1xi1>
      %83 = vector.broadcast %82 : vector<8x1xi1> to vector<8x128xi1>
      %84 = arith.select %83, %78, %arg14 : vector<8x128xi1>, vector<8x128xf32>
      %85 = vector.shape_cast %81 : vector<8x1xi1> to vector<8x1xi1>
      %86 = vector.broadcast %85 : vector<8x1xi1> to vector<8x128xi1>
      %87 = arith.select %86, %76, %arg15 : vector<8x128xi1>, vector<8x128xf32>
      %88 = arith.index_cast %arg13 : i32 to index
      %c0_34 = arith.constant 0 : index
      %c0_35 = arith.constant 0 : index
      %89 = vector.load %arg11[%88, %c0_34, %c0_35] : memref<7x8x128xf32, #tpu.memory_space<vmem>>, vector<1x8x128xf32>
      %90 = vector.shape_cast %89 : vector<1x8x128xf32> to vector<8x128xf32>
      %91 = vector.shape_cast %84 : vector<8x128xf32> to vector<1x8x128xf32>
      tpu.vector_store %arg11[%88, %c0_34, %c0_35], %91 {strides = array<i32>} : memref<7x8x128xf32, #tpu.memory_space<vmem>>, vector<1x8x128xf32>,
      %cst_36 = arith.constant 0.000000e+00 : f32
      %92 = vector.shape_cast %81 : vector<8x1xi1> to vector<8x1xi1>
      %93 = vector.broadcast %92 : vector<8x1xi1> to vector<8x128xi1>
      %94 = vector.broadcast %cst_36 : f32 to vector<8x128xf32>
      %95 = arith.select %93, %40, %94 : vector<8x128xi1>, vector<8x128xf32>
      %96 = arith.index_cast %arg13 : i32 to index
      %c0_37 = arith.constant 0 : index
      %c0_38 = arith.constant 0 : index
      %97 = vector.load %arg12[%96, %c0_37, %c0_38] : memref<7x8x128xf32, #tpu.memory_space<vmem>>, vector<1x8x128xf32>
      %98 = vector.shape_cast %97 : vector<1x8x128xf32> to vector<8x128xf32>
      %99 = vector.shape_cast %95 : vector<8x128xf32> to vector<1x8x128xf32>
      tpu.vector_store %arg12[%96, %c0_37, %c0_38], %99 {strides = array<i32>} : memref<7x8x128xf32, #tpu.memory_space<vmem>>, vector<1x8x128xf32>,
      scf.yield %84, %87 : vector<8x128xf32>, vector<8x128xf32>
    }
    %c7_i32_3 = arith.constant 7 : i32
    return
  }
}

</mosaic_0001>

<bundles_post_ra>
// kernel: tpu_custom_call.1
= control target key start
LH: loop header
LB: loop body
LE: loop exit
PB: predicated region body
PF: predicated region fallthrough
CT: control target
= control target key end

     0   :  { %18 = vsyncpa [#allocation3], 0  ;;  %s2492_s0 = inlined_call_operand.hbm [shape: f32[8,32,128], index: 0, kind: input, shape index: {}]   ;;  %s2493_s1 = inlined_call_operand.hbm [shape: f32[8,32,128], index: 1, kind: input, shape index: {}]   ;;  %s2494_s2 = inlined_call_operand.vmem [shape: f32[1,128], index: 2, kind: input, shape index: {}]   ;;  %s2495_s3 = inlined_call_operand.hbm [shape: f32[7,8,512], index: 3, kind: input, shape index: {}]   ;;  %s2496_s4 = inlined_call_operand.vmem [shape: s32[8,1], index: 4, kind: input, shape index: {}]   ;;  %s2497_s5 = inlined_call_operand.vmem [shape: f32[32,1], index: 5, kind: input, shape index: {}]   ;;  %s2498_s6 = inlined_call_operand.hbm [shape: f32[128,768], index: 6, kind: input, shape index: {}]   ;;  %s2499_s7 = inlined_call_operand.vmem [shape: f32[1,32], index: 7, kind: input, shape index: {}]   ;;  %s2500_s8 = inlined_call_operand.hbm [shape: f32[32,512], index: 8, kind: input, shape index: {}]   ;;  %s2501_s9 = inlined_call_operand.vmem [shape: f32[8,128], index: 9, kind: input, shape index: {}]   ;;  %s2502_s10 = inlined_call_operand.vmem [shape: f32[8,128], index: 10, kind: input, shape index: {}]   ;;  %s2503_s11 = inlined_call_operand.hbm [shape: f32[7,8,128], index: 11, kind: output, shape index: {0}]   ;;  %s2504_s12 = inlined_call_operand.hbm [shape: f32[7,8,128], index: 12, kind: output, shape index: {1}]  }
   0x1   :  { %19 = vsyncpa [#allocation6], 0 }
   0x2   :  { %20 = vsyncpa [#allocation9], 0 }
   0x3   :  { %21 = vsyncpa [#allocation4], 0 }
   0x4   :  { %22 = vsyncpa [#allocation13], 0  ;;  %s2008_s21 = smov [#allocation5]   ;;  %s2009_s23 = smov [#allocation8]  }
   0x5   :  { %s40_s22 = sshll.u32 %s2008_s21, 4  ;;  %s70_s24 = sshll.u32 %s2009_s23, 4  ;;  %s41_s22 = int_to_ptr.vmem [resolvable:$true] %s40_s22  ;;  %s2088_s24 = int_to_ptr.vmem [resolvable:$true] %s70_s24 }
   0x6   :  { %s1820_s27 = scalar_lea.hbm %s2493_s1, 4096 }
   0x7   :  { %p1821_p0 = scmp.ne.s32.totalorder %s2493_s1, %s1820_s27  ;;  %p1824_p1 = scmp.lt.u32.totalorder %s1820_s27, %s2493_s1 }
   0x9   :  { %p1826_p2 = pnand %p1824_p1, %p1821_p0 }
   0xb   :  { %1829 = shalt.err (!%p1826_p2)
}
   0xc   :  { %s1830_s14 = scalar_lea.vmem %s41_s22, 4096  ;;  %p1835_p4 = scmp.lt.s32.totalorder %s41_s22, %s41_s22 }
   0xd   :  { %p1831_p3 = scmp.ne.s32.totalorder %s41_s22, %s1830_s14  ;;  %p1836_p5 = scmp.lt.s32.totalorder %s1830_s14, %s1830_s14 }
   0xf   :  { %p1837_p6 = por %p1836_p5, %p1835_p4 }
  0x11   :  { %p1838_p7 = pnand %p1837_p6, %p1831_p3 }
  0x13   :  { %1841 = shalt.err (!%p1838_p7)
}
  0x14   :  { %s2010_s15 = smov 128   ;;  %s2011_s16 = smov 8  }
  0x15   :  { %46 = dma.hbm_to_vmem [thread:$0]  %s2493_s1, 4096, %s41_s22, [#allocation6], %s2010_s15, %s2010_s15, %s2011_s16  }
  0x16   :  { %s1842_s21 = scalar_lea.hbm %s2498_s6, 12288 }
  0x17   :  { %p1843_p8 = scmp.ne.s32.totalorder %s2498_s6, %s1842_s21  ;;  %p1846_p9 = scmp.lt.u32.totalorder %s1842_s21, %s2498_s6 }
  0x19   :  { %p1848_p10 = pnand %p1846_p9, %p1843_p8 }
  0x1b   :  { %1851 = shalt.err (!%p1848_p10)
}
  0x1c   :  { %s1852_s28 = scalar_lea.vmem %s2088_s24, 12288  ;;  %p1857_p12 = scmp.lt.s32.totalorder %s2088_s24, %s2088_s24 }
  0x1d   :  { %p1853_p11 = scmp.ne.s32.totalorder %s2088_s24, %s1852_s28  ;;  %p1858_p13 = scmp.lt.s32.totalorder %s1852_s28, %s1852_s28 }
  0x1f   :  { %p1859_p0 = por %p1858_p13, %p1857_p12 }
  0x21   :  { %p1860_p1 = pnand %p1859_p0, %p1853_p11 }
  0x23   :  { %1863 = shalt.err (!%p1860_p1)
}
  0x24   :  { %s2012_s1 = smov 768   ;;  %s2013_s22 = smov 48  }
  0x25   :  { %76 = dma.hbm_to_vmem [thread:$0]  %s2498_s6, 12288, %s2088_s24, [#allocation9], %s2012_s1, %s2012_s1, %s2013_s22  }
  0x26   :  { %s2014_s13 = smov [#allocation2]   ;;  %s2015_s17 = smov [#allocation7]  }
  0x27   :  { %s28_s14 = sshll.u32 %s2014_s13, 4  ;;  %s54_s18 = sshll.u32 %s2015_s17, 4  ;;  %s29_s14 = int_to_ptr.vmem [resolvable:$true] %s28_s14  ;;  %s2122_s18 = int_to_ptr.vmem [resolvable:$true] %s54_s18 }
  0x28   :  { %s1864_s21 = scalar_lea.hbm %s2492_s0, 4096 }
  0x29   :  { %p1865_p2 = scmp.ne.s32.totalorder %s2492_s0, %s1864_s21  ;;  %p1868_p3 = scmp.lt.u32.totalorder %s1864_s21, %s2492_s0 }
  0x2b   :  { %p1870_p4 = pnand %p1868_p3, %p1865_p2 }
  0x2d   :  { %1873 = shalt.err (!%p1870_p4)
}
  0x2e   :  { %s1874_s6 = scalar_lea.vmem %s29_s14, 4096  ;;  %p1879_p6 = scmp.lt.s32.totalorder %s29_s14, %s29_s14 }
  0x2f   :  { %p1875_p5 = scmp.ne.s32.totalorder %s29_s14, %s1874_s6  ;;  %p1880_p7 = scmp.lt.s32.totalorder %s1874_s6, %s1874_s6 }
  0x31   :  { %p1881_p8 = por %p1880_p7, %p1879_p6 }
  0x33   :  { %p1882_p9 = pnand %p1881_p8, %p1875_p5 }
  0x35   :  { %1885 = shalt.err (!%p1882_p9)
}
  0x36   :  { %34 = dma.hbm_to_vmem [thread:$0]  %s2492_s0, 4096, %s29_s14, [#allocation3], %s2010_s15, %s2010_s15, %s2011_s16  }
  0x37   :  { %s1886_s29 = scalar_lea.hbm %s2495_s3, 3584 }
  0x38   :  { %p1887_p10 = scmp.ne.s32.totalorder %s2495_s3, %s1886_s29  ;;  %p1890_p11 = scmp.lt.u32.totalorder %s1886_s29, %s2495_s3 }
  0x3a   :  { %p1892_p12 = pnand %p1890_p11, %p1887_p10 }
  0x3c   :  { %1895 = shalt.err (!%p1892_p12)
}
  0x3d   :  { %s1896_s20 = scalar_lea.vmem %s2122_s18, 3584  ;;  %p1901_p0 = scmp.lt.s32.totalorder %s2122_s18, %s2122_s18 }
  0x3e   :  { %p1897_p13 = scmp.ne.s32.totalorder %s2122_s18, %s1896_s20  ;;  %p1902_p1 = scmp.lt.s32.totalorder %s1896_s20, %s1896_s20 }
  0x40   :  { %p1903_p2 = por %p1902_p1, %p1901_p0 }
  0x42   :  { %p1904_p3 = pnand %p1903_p2, %p1897_p13 }
  0x44   :  { %1907 = shalt.err (!%p1904_p3)
}
  0x45   :  { %s2016_s0 = smov 512   ;;  %s2017_s14 = smov 32  }
  0x46   :  { %60 = dma.hbm_to_vmem [thread:$0]  %s2495_s3, 3584, %s2122_s18, [#allocation6], %s2016_s0, %s2016_s0, %s2017_s14  }
  0x47   :  { %s2018_s25 = smov [#allocation10]   ;;  %s1908_s24 = scalar_lea.hbm %s2500_s8, 2048 }
  0x48   :  { %s84_s26 = sshll.u32 %s2018_s25, 4  ;;  %p1909_p4 = scmp.ne.s32.totalorder %s2500_s8, %s1908_s24  ;;  %s85_s26 = int_to_ptr.vmem [resolvable:$true] %s84_s26 }
  0x49   :  { %p1912_p5 = scmp.lt.u32.totalorder %s1908_s24, %s2500_s8 }
  0x4b   :  { %p1914_p6 = pnand %p1912_p5, %p1909_p4 }
  0x4d   :  { %1917 = shalt.err (!%p1914_p6)
}
  0x4e   :  { %s1918_s30 = scalar_lea.vmem %s85_s26, 2048  ;;  %p1923_p8 = scmp.lt.s32.totalorder %s85_s26, %s85_s26 }
  0x4f   :  { %p1919_p7 = scmp.ne.s32.totalorder %s85_s26, %s1918_s30  ;;  %p1924_p9 = scmp.lt.s32.totalorder %s1918_s30, %s1918_s30 }
  0x51   :  { %p1925_p10 = por %p1924_p9, %p1923_p8 }
  0x53   :  { %p1926_p11 = pnand %p1925_p10, %p1919_p7 }
  0x55   :  { %1929 = shalt.err (!%p1926_p11)
}
  0x56   :  { %90 = dma.hbm_to_vmem [thread:$0]  %s2500_s8, 2048, %s85_s26, [#allocation9], %s2016_s0, %s2016_s0, %s2017_s14  }
  0x57   :  { %1986 = dma.done.wait [#allocation3], 4096  }
  0x58   :  { %1987 = vsyncadd [#allocation3], 4294963200 }
  0x59   :  { %1988 = dma.done.wait [#allocation6], 7680  }
  0x5a   :  { %1989 = vsyncadd [#allocation6], 4294959616 }
  0x5b   :  { %1990 = dma.done.wait [#allocation9], 14336  }
  0x5c   :  { %1991 = vsyncadd [#allocation9], 4294952960  ;;  %v110_v0 = vld [vmem:[%s2501_s9] sm:$0xff]   ;;  %s2178_s21 = smov 0  }
  0x5d   :  { %v111_v1 = vld [vmem:[%s2502_s10] sm:$0xff]  }
  0x5e LB: > { %v121_v2 = vld [vmem:[#allocation8 + $0x8] sm:$0xff]  ;;  %v127_v3 = vld [vmem:[#allocation8 + $0x38] sm:$0xff]  ;;  %v120_v4 = vld [vmem:[#allocation8] sm:$0xff]  ;;  %v2019_v9 = vmov 0.0   ;;  %v2020_v10 = vmov 0   ;;  %v475_v56 = vlaneseq  ;;  %vm843_vm0 = vcmask 1041409   ;;  %s2006_s21 = sphi %s2178_s21, %s117_s21   ;;  %v2002_v0 = vphi %v110_v0, %v1526_v0   ;;  %v1998_v1 = vphi %v111_v1, %v1527_v1  }
  0x5f   : > { %v1621_v5 = vpack.c.bf16 %v127_v3, %v121_v2  ;;  %v126_v6 = vld [vmem:[#allocation8 + $0x30] sm:$0xff]  ;;  %v133_v7 = vld [vmem:[#allocation8 + $0x68] sm:$0xff]  ;;  %v139_v8 = vld [vmem:[#allocation8 + $0x98] sm:$0xff]  ;;  %280 = vmatprep.mubr.f32.mxu0 %v2019_v9  ;;  %1780 = vset.pattern.permute.xlu0 %v2020_v10  ;;  %vm846_vm1 = vcmask 1042434   ;;  %vm849_vm2 = vcmask 1043459   ;;  %vm852_vm3 = vcmask 1044484  }
  0x60   : > { %v1623_v11 = vpack.c.bf16 %v126_v6, %v120_v4  ;;  %v1625_v12 = vpack.c.bf16 %v139_v8, %v133_v7  ;;  %v132_v13 = vld [vmem:[#allocation8 + $0x60] sm:$0xff]  ;;  %v138_v14 = vld [vmem:[#allocation8 + $0x90] sm:$0xff]  ;;  %v145_v15 = vld [vmem:[#allocation8 + $0xc8] sm:$0xff]  ;;  %1781 = vset.pattern.permute.xlu1 %v2020_v10  ;;  %351 = vmatprep.mubr.f32.mxu1 %v2019_v9  ;;  %v2208_v57 = vshrl.u32 %v475_v56, 7  ;;  %vm855_vm4 = vcmask 1045509   ;;  %s1619_s29 = sshll.u32 %s2006_s21, 3 }
  0x61   : > { %1622 = vmatprep.subr.bf16.mxu0 %v1621_v5  ;;  %v151_v16 = vld [vmem:[#allocation8 + $0xf8] sm:$0xff]  ;;  %v1627_v17 = vpack.c.bf16 %v138_v14, %v132_v13  ;;  %v144_v19 = vld [vmem:[#allocation8 + $0xc0] sm:$0xff]  ;;  %v150_v20 = vld [vmem:[#allocation8 + $0xf0] sm:$0xff]  ;;  %vm858_vm5 = vcmask 1046534   ;;  %vm861_vm6 = vcmask 1047559   ;;  %vm1159_vm8 = vcmask 130112  }
  0x62   : > { %1624 = vmatpush1.bf16.msra.mxu0 %v1623_v11  ;;  %v1629_v18 = vpack.c.bf16 %v151_v16, %v145_v15  ;;  %v157_v21 = vld [vmem:[#allocation8 + $0x128] sm:$0xff]  ;;  %v163_v22 = vld [vmem:[#allocation8 + $0x158] sm:$0xff]  ;;  %v1631_v23 = vpack.c.bf16 %v150_v20, %v144_v19  ;;  %v156_v25 = vld [vmem:[#allocation8 + $0x120] sm:$0xff]  ;;  %v496_v58 = vsub.s32 1, %v2208_v57  ;;  %v515_v62 = vsub.s32 2, %v2208_v57  ;;  %s1555_s30 = scalar_lea.vmem [#allocation12], %s1619_s29 }
  0x63   : > { %1626 = vmatprep.subr.bf16.mxu0 %v1625_v12  ;;  %v1633_v24 = vpack.c.bf16 %v163_v22, %v157_v21  ;;  %v162_v26 = vld [vmem:[#allocation8 + $0x150] sm:$0xff]  ;;  %v169_v27 = vld [vmem:[#allocation8 + $0x188] sm:$0xff]  ;;  %v175_v28 = vld [vmem:[#allocation8 + $0x1b8] sm:$0xff]  ;;  %v2215_v2 = vsub.s32 0, %v2208_v57  ;;  %v534_v4 = vsub.s32 3, %v2208_v57  ;;  %v553_v6 = vsub.s32 4, %v2208_v57 }
  0x64   : > { %v691_v29 = vld [vmem:[%s2497_s5] sm:$0xff]  ;;  %v693_v30 = vld [vmem:[%s2497_s5 + $0x10] sm:$0xff]  ;;  %v1635_v31 = vpack.c.bf16 %v162_v26, %v156_v25  ;;  %v692_v32 = vld [vmem:[%s2497_s5 + $0x8] sm:$0xff]  ;;  %v1637_v33 = vpack.c.bf16 %v175_v28, %v169_v27  ;;  %v572_v8 = vsub.s32 5, %v2208_v57  ;;  %v591_v12 = vsub.s32 6, %v2208_v57  ;;  %s1620_s3 = sshll.u32 %s2006_s21, 5 }
  0x65   : > { %697 = vperm.xlu0 %1780, %v691_v29   ;;  %707 = vperm.xlu1 %1781, %v693_v30   ;;  %v168_v34 = vld [vmem:[#allocation8 + $0x180] sm:$0xff]  ;;  %v174_v35 = vld [vmem:[#allocation8 + $0x1b0] sm:$0xff]  ;;  %v694_v36 = vld [vmem:[%s2497_s5 + $0x18] sm:$0xff]  ;;  %v610_v14 = vsub.s32 7, %v2208_v57  ;;  %vm1166_vm9 = vcmask 195712   ;;  %vm1173_vm10 = vcmask 261312  }
  0x66   : > { %1628 = vmatpush1.bf16.msra.mxu0 %v1627_v17  ;;  %v181_v37 = vld [vmem:[#allocation8 + $0x1e8] sm:$0xff]  ;;  %v187_v38 = vld [vmem:[#allocation8 + $0x218] sm:$0xff]  ;;  %v1639_v39 = vpack.c.bf16 %v174_v35, %v168_v34  ;;  %v180_v41 = vld [vmem:[#allocation8 + $0x1e0] sm:$0xff]  ;;  %vm1340_vm12 = vcmask 261120   ;;  %s1319_s18 = scalar_lea.vmem [#allocation7], %s1620_s3  ;;  %s1529_s13 = scalar_lea.vmem [#allocation11], %s1619_s29 }
  0x67   : > { %1630 = vmatprep.subr.bf16.mxu0 %v1629_v18  ;;  %v1641_v40 = vpack.c.bf16 %v187_v38, %v181_v37  ;;  %v186_v42 = vld [vmem:[#allocation8 + $0x210] sm:$0xff]  ;;  %v193_v43 = vld [vmem:[#allocation8 + $0x248] sm:$0xff]  ;;  %v199_v44 = vld [vmem:[#allocation8 + $0x278] sm:$0xff] }
  0x68   : > { %v1643_v45 = vpack.c.bf16 %v186_v42, %v180_v41  ;;  %v1645_v46 = vpack.c.bf16 %v199_v44, %v193_v43  ;;  %v192_v47 = vld [vmem:[#allocation8 + $0x240] sm:$0xff]  ;;  %v198_v48 = vld [vmem:[#allocation8 + $0x270] sm:$0xff]  ;;  %v205_v49 = vld [vmem:[#allocation8 + $0x2a8] sm:$0xff] }
  0x69   : > { %702 = vperm.xlu0 %1780, %v692_v32   ;;  %712 = vperm.xlu1 %1781, %v694_v36   ;;  %v211_v50 = vld [vmem:[#allocation8 + $0x2d8] sm:$0xff]  ;;  %v1647_v51 = vpack.c.bf16 %v198_v48, %v192_v47  ;;  %v204_v53 = vld [vmem:[#allocation8 + $0x2a0] sm:$0xff]  ;;  %v210_v54 = vld [vmem:[#allocation8 + $0x2d0] sm:$0xff] }
  0x6a   : > { %1632 = vmatpush1.bf16.msra.mxu0 %v1631_v23  ;;  %v1649_v52 = vpack.c.bf16 %v211_v50, %v205_v49  ;;  %v1651_v55 = vpack.c.bf16 %v210_v54, %v204_v53  ;;  %v448_v30 = vld [vmem:[#allocation5 + $0x28] sm:$0xff]  ;;  %v449_v34 = vld [vmem:[#allocation5 + $0x30] sm:$0xff]  ;;  %v450_v37 = vld [vmem:[#allocation5 + $0x38] sm:$0xff] }
  0x6b   : > { %1634 = vmatprep.subr.bf16.mxu0 %v1633_v24  ;;  %v451_v41 = vld [vmem:[#allocation5 + $0x40] sm:$0xff]  ;;  %v444_v43 = vld [vmem:[#allocation5 + $0x8] sm:$0xff] }
  0x6c   : > { %v443_v44 = vld [vmem:[#allocation5] sm:$0xff] }
  0x6e   : > { %1636 = vmatpush1.bf16.msra.mxu0 %v1635_v31  ;;  %v447_v31 = vld [vmem:[#allocation5 + $0x20] sm:$0xff] }
  0x6f   : > { %1638 = vmatprep.subr.bf16.mxu0 %v1637_v33 }
  0x72   : > { %1640 = vmatpush1.bf16.msra.mxu0 %v1639_v39 }
  0x73   : > { %1642 = vmatprep.subr.bf16.mxu0 %v1641_v40  ;;  %v452_v40 = vld [vmem:[#allocation5 + $0x48] sm:$0xff] }
  0x76   : > { %1644 = vmatpush1.bf16.msra.mxu0 %v1643_v45 }
  0x77   : > { %1646 = vmatprep.subr.bf16.mxu0 %v1645_v46 }
  0x7a   : > { %1648 = vmatpush1.bf16.msra.mxu0 %v1647_v51 }
  0x7b   : > { %1650 = vmatprep.subr.bf16.mxu0 %v1649_v52 }
  0x7e   : > { %1652 = vmatpush1.bf16.msra.mxu0 %v1651_v55 }
  0x81   : > { %281 = vmatmul.mubr.f32.vlgmr.msra.gmra.mrb[0].mxu0 %v2002_v0 }
  0x82   : > { %422 = vmatprep.mubr.f32.mxu0 %v2019_v9 }
  0xe4   : > { %v2223_v16 = vpop.permute.xlu0 %697  ;;  %v2225_v17 = vpop.permute.xlu1 %707 }
  0xe8   : > { %v2227_v18 = vpop.permute.xlu0 %702  ;;  %v2229_v19 = vpop.permute.xlu1 %712 }
 0x154   : > { %v282_v59 = vpop.f32.mrb[0].mxu0 }
 0x155   : > { %v2211_v60 = vpop.f32.mrb[1].mxu0  ;;  %v497_v61 = vrot.slane %v282_v59, %v496_v58  ;;  %v516_v63 = vrot.slane %v282_v59, %v515_v62  ;;  %v478_v3 = vrot.slane %v282_v59, %v2215_v2  ;;  %v535_v5 = vrot.slane %v282_v59, %v534_v4 }
 0x156   : > { %v554_v7 = vrot.slane %v282_v59, %v553_v6  ;;  %v573_v11 = vrot.slane %v282_v59, %v572_v8  ;;  %v592_v13 = vrot.slane %v282_v59, %v591_v12  ;;  %v611_v15 = vrot.slane %v282_v59, %v610_v14  ;;  %v453_v59 = vld [vmem:[#allocation5 + $0x50] sm:$0xff] }
 0x157   : > { %503 = vbcast.lane.b32.xlu0 %v497_v61, 264  ;;  %499 = vbcast.lane.b32.xlu1 %v497_v61, 256 }
 0x15b   : > { %522 = vbcast.lane.b32.xlu0 %v516_v63, 264  ;;  %518 = vbcast.lane.b32.xlu1 %v516_v63, 256 }
 0x15f   : > { %484 = vbcast.lane.b32.xlu1 %v478_v3, 264  ;;  %480 = vbcast.lane.b32.xlu0 %v478_v3, 256 }
 0x163   : > { %537 = vbcast.lane.b32.xlu1 %v535_v5, 256  ;;  %507 = vbcast.lane.b32.xlu0 %v497_v61, 272 }
 0x167   : > { %526 = vbcast.lane.b32.xlu1 %v516_v63, 272  ;;  %541 = vbcast.lane.b32.xlu0 %v535_v5, 264 }
 0x16b   : > { %560 = vbcast.lane.b32.xlu1 %v554_v7, 264  ;;  %556 = vbcast.lane.b32.xlu0 %v554_v7, 256 }
 0x16f   : > { %511 = vbcast.lane.b32.xlu1 %v497_v61, 280  ;;  %488 = vbcast.lane.b32.xlu0 %v478_v3, 272  ;;  %v456_v61 = vld [vmem:[#allocation5 + $0x68] sm:$0xff] }
 0x173   : > { %575 = vbcast.lane.b32.xlu1 %v573_v11, 256  ;;  %545 = vbcast.lane.b32.xlu0 %v535_v5, 272 }
 0x177   : > { %530 = vbcast.lane.b32.xlu1 %v516_v63, 280  ;;  %579 = vbcast.lane.b32.xlu0 %v573_v11, 264  ;;  %v445_v63 = vld [vmem:[#allocation5 + $0x10] sm:$0xff] }
 0x17b   : > { %594 = vbcast.lane.b32.xlu1 %v592_v13, 256  ;;  %564 = vbcast.lane.b32.xlu0 %v554_v7, 272 }
 0x17f   : > { %492 = vbcast.lane.b32.xlu1 %v478_v3, 280  ;;  %598 = vbcast.lane.b32.xlu0 %v592_v13, 264 }
 0x183   : > { %583 = vbcast.lane.b32.xlu1 %v573_v11, 272  ;;  %549 = vbcast.lane.b32.xlu0 %v535_v5, 280  ;;  %v455_v5 = vld [vmem:[#allocation5 + $0x60] sm:$0xff] }
 0x187   : > { %617 = vbcast.lane.b32.xlu1 %v611_v15, 264  ;;  %613 = vbcast.lane.b32.xlu0 %v611_v15, 256 }
 0x18b   : > { %602 = vbcast.lane.b32.xlu1 %v592_v13, 272  ;;  %568 = vbcast.lane.b32.xlu0 %v554_v7, 280 }
 0x18f   : > { %621 = vbcast.lane.b32.xlu1 %v611_v15, 272  ;;  %587 = vbcast.lane.b32.xlu0 %v573_v11, 280 }
 0x193   : > { %625 = vbcast.lane.b32.xlu1 %v611_v15, 280  ;;  %606 = vbcast.lane.b32.xlu0 %v592_v13, 280  ;;  %v454_v13 = vld [vmem:[#allocation5 + $0x58] sm:$0xff] }
 0x1c9   : > { %v504_v20 = vpop.permute.xlu0 %503  ;;  %v500_v21 = vpop.permute.xlu1 %499 }
 0x1ca   : > { %v632_v35 = vadd.f32 %v504_v20, %v448_v30  ;;  %v631_v36 = vadd.f32 %v500_v21, %v447_v31  ;;  %v457_v21 = vld [vmem:[#allocation5 + $0x70] sm:$0xff]  ;;  %v460_v30 = vld [vmem:[#allocation5 + $0x88] sm:$0xff]  ;;  %v459_v31 = vld [vmem:[#allocation5 + $0x80] sm:$0xff] }
 0x1cc   : > { %v664_v45 = vmax.f32 %v632_v35, 0.0  ;;  %v663_v46 = vmax.f32 %v631_v36, 0.0 }
 0x1cd   : > { %v523_v22 = vpop.permute.xlu0 %522  ;;  %v519_v23 = vpop.permute.xlu1 %518 }
 0x1ce   : > { %v636_v48 = vadd.f32 %v523_v22, %v452_v40  ;;  %v635_v49 = vadd.f32 %v519_v23, %v451_v41  ;;  %v720_v55 = vmul.f32 %v2227_v18, %v664_v45  ;;  %v719_v58 = vmul.f32 %v2223_v16, %v663_v46  ;;  %v446_v45 = vld [vmem:[#allocation5 + $0x18] sm:$0xff] }
 0x1d0   : > { %v668_v3 = vmax.f32 %v636_v48, 0.0  ;;  %v667_v4 = vmax.f32 %v635_v49, 0.0  ;;  %v756_v22 = vadd.f32 %v720_v55, %v719_v58  ;;  %v464_v55 = vld [vmem:[#allocation5 + $0xa8] sm:$0xff] }
 0x1d1   : > { %v485_v24 = vpop.permute.xlu1 %484  ;;  %v481_v25 = vpop.permute.xlu0 %480 }
 0x1d2   : > { %v628_v52 = vadd.f32 %v485_v24, %v444_v43  ;;  %v627_v53 = vadd.f32 %v481_v25, %v443_v44  ;;  %v724_v25 = vmul.f32 %v2227_v18, %v668_v3 }
 0x1d4   : > { %v660_v8 = vmax.f32 %v628_v52, 0.0  ;;  %v659_v11 = vmax.f32 %v627_v53, 0.0  ;;  %v463_v53 = vld [vmem:[#allocation5 + $0xa0] sm:$0xff] }
 0x1d5   : > { %v538_v26 = vpop.permute.xlu1 %537  ;;  %v508_v27 = vpop.permute.xlu0 %507 }
 0x1d6   : > { %v633_v42 = vadd.f32 %v508_v27, %v449_v34  ;;  %v639_v23 = vadd.f32 %v538_v26, %v455_v5  ;;  %v723_v27 = vmul.f32 %v2223_v16, %v667_v4 }
 0x1d8   : > { %v665_v54 = vmax.f32 %v633_v42, 0.0  ;;  %v671_v41 = vmax.f32 %v639_v23, 0.0  ;;  %v765_v49 = vadd.f32 %v724_v25, %v723_v27  ;;  %v465_v25 = vld [vmem:[#allocation5 + $0xb0] sm:$0xff] }
 0x1d9   : > { %v527_v28 = vpop.permute.xlu1 %526  ;;  %v542_v29 = vpop.permute.xlu0 %541 }
 0x1da   : > { %v721_v12 = vmul.f32 %v2225_v17, %v665_v54  ;;  %v637_v14 = vadd.f32 %v527_v28, %v453_v59  ;;  %v640_v15 = vadd.f32 %v542_v29, %v456_v61  ;;  %v715_v28 = vmul.f32 %v2223_v16, %v659_v11  ;;  %v461_v61 = vld [vmem:[#allocation5 + $0x90] sm:$0xff] }
 0x1dc   : > { %v757_v29 = vadd.f32 %v756_v22, %v721_v12  ;;  %v672_v26 = vmax.f32 %v640_v15, 0.0 }
 0x1dd   : > { %v561_v32 = vpop.permute.xlu1 %560  ;;  %v557_v33 = vpop.permute.xlu0 %556 }
 0x1de   : > { %v644_v42 = vadd.f32 %v561_v32, %v460_v30  ;;  %v643_v43 = vadd.f32 %v557_v33, %v459_v31  ;;  %v458_v32 = vld [vmem:[#allocation5 + $0x78] sm:$0xff]  ;;  %v727_v33 = vmul.f32 %v2223_v16, %v671_v41 }
 0x1e0   : > { %v675_v3 = vmax.f32 %v643_v43, 0.0 }
 0x1e1   : > { %v512_v38 = vpop.permute.xlu1 %511  ;;  %v489_v39 = vpop.permute.xlu0 %488 }
 0x1e2   : > { %v634_v47 = vadd.f32 %v512_v38, %v450_v37  ;;  %v629_v20 = vadd.f32 %v489_v39, %v445_v63  ;;  %v716_v37 = vmul.f32 %v2227_v18, %v660_v8  ;;  %v669_v39 = vmax.f32 %v637_v14, 0.0 }
 0x1e3   : > { %v676_v63 = vmax.f32 %v644_v42, 0.0  ;;  %v468_v42 = vld [vmem:[#allocation5 + $0xc8] sm:$0xff] }
 0x1e4   : > { %v666_v62 = vmax.f32 %v634_v47, 0.0  ;;  %v661_v40 = vmax.f32 %v629_v20, 0.0  ;;  %v747_v52 = vadd.f32 %v716_v37, %v715_v28  ;;  %v725_v58 = vmul.f32 %v2225_v17, %v669_v39  ;;  %v471_v39 = vld [vmem:[#allocation5 + $0xe0] sm:$0xff] }
 0x1e5   : > { %v2231_v50 = vpop.permute.xlu1 %575  ;;  %v546_v51 = vpop.permute.xlu0 %545  ;;  %v732_v27 = vmul.f32 %v2227_v18, %v676_v63 }
 0x1e6   : > { %v722_v24 = vmul.f32 %v2229_v19, %v666_v62  ;;  %v641_v38 = vadd.f32 %v546_v51, %v457_v21  ;;  %v728_v51 = vmul.f32 %v2227_v18, %v672_v26  ;;  %v717_v59 = vmul.f32 %v2225_v17, %v661_v40 }
 0x1e7   : > { %v647_v5 = vadd.f32 %v2231_v50, %v463_v53  ;;  %v766_v21 = vadd.f32 %v765_v49, %v725_v58  ;;  %v731_v50 = vmul.f32 %v2223_v16, %v675_v3 }
 0x1e8   : > { %v758_v44 = vadd.f32 %v757_v29, %v722_v24  ;;  %v673_v54 = vmax.f32 %v641_v38, 0.0  ;;  %v774_v22 = vadd.f32 %v728_v51, %v727_v33  ;;  %v748_v23 = vadd.f32 %v747_v52, %v717_v59  ;;  %v467_v29 = vld [vmem:[#allocation5 + $0xc0] sm:$0xff] }
 0x1e9   : > { %v531_v6 = vpop.permute.xlu1 %530  ;;  %v580_v7 = vpop.permute.xlu0 %579  ;;  %v783_v58 = vadd.f32 %v732_v27, %v731_v50 }
 0x1ea   : > { %v638_v34 = vadd.f32 %v531_v6, %v454_v13  ;;  %v759_v4 = vrot.slane %v758_v44, 4  ;;  %v648_v8 = vadd.f32 %v580_v7, %v464_v55  ;;  %v729_v14 = vmul.f32 %v2225_v17, %v673_v54  ;;  %v472_v7 = vld [vmem:[#allocation5 + $0xe8] sm:$0xff]  ;;  %v469_v54 = vld [vmem:[#allocation5 + $0xd0] sm:$0xff]  ;;  %v462_v55 = vld [vmem:[#allocation5 + $0x98] sm:$0xff] }
 0x1ec   : > { %v670_v46 = vmax.f32 %v638_v34, 0.0  ;;  %v760_v30 = vadd.f32 %v759_v4, %v758_v44  ;;  %v679_v34 = vmax.f32 %v647_v5, 0.0  ;;  %v680_v28 = vmax.f32 %v648_v8, 0.0 }
 0x1ed   : > { %v2239_v35 = vpop.permute.xlu1 %594  ;;  %v565_v36 = vpop.permute.xlu0 %564  ;;  %v775_v40 = vadd.f32 %v774_v22, %v729_v14 }
 0x1ee   : > { %v726_v6 = vmul.f32 %v2229_v19, %v670_v46  ;;  %v645_v15 = vadd.f32 %v565_v36, %v461_v61  ;;  %v761_v49 = vrot.slane %v760_v30, 2  ;;  %v651_v44 = vadd.f32 %v2239_v35, %v467_v29 }
 0x1ef   : > { %v736_v59 = vmul.f32 %v2227_v18, %v680_v28  ;;  %v735_v33 = vmul.f32 %v2223_v16, %v679_v34 }
 0x1f0   : > { %v767_v37 = vadd.f32 %v766_v21, %v726_v6  ;;  %v677_v41 = vmax.f32 %v645_v15, 0.0  ;;  %v683_v14 = vmax.f32 %v651_v44, 0.0 }
 0x1f1   : > { %v493_v47 = vpop.permute.xlu1 %492  ;;  %v599_v48 = vpop.permute.xlu0 %598 }
 0x1f2   : > { %v630_v62 = vadd.f32 %v493_v47, %v446_v45  ;;  %v768_v51 = vrot.slane %v767_v37, 4  ;;  %v652_v61 = vadd.f32 %v599_v48, %v468_v42  ;;  %v733_v63 = vmul.f32 %v2225_v17, %v677_v41 }
 0x1f3   : > { %v792_v48 = vadd.f32 %v736_v59, %v735_v33  ;;  %v739_v42 = vmul.f32 %v2223_v16, %v683_v14 }
 0x1f4   : > { %v662_v11 = vmax.f32 %v630_v62, 0.0  ;;  %v769_v21 = vadd.f32 %v768_v51, %v767_v37  ;;  %v684_v22 = vmax.f32 %v652_v61, 0.0  ;;  %v784_v27 = vadd.f32 %v783_v58, %v733_v63 }
 0x1f5   : > { %v584_v12 = vpop.permute.xlu1 %583  ;;  %v550_v13 = vpop.permute.xlu0 %549 }
 0x1f6   : > { %v642_v20 = vadd.f32 %v550_v13, %v458_v32  ;;  %v718_v24 = vmul.f32 %v2229_v19, %v662_v11  ;;  %v649_v43 = vadd.f32 %v584_v12, %v465_v25  ;;  %v473_v11 = vld [vmem:[#allocation5 + $0xf0] sm:$0xff]  ;;  %v466_v12 = vld [vmem:[#allocation5 + $0xb8] sm:$0xff]  ;;  %v762_v13 = vadd.f32 %v761_v49, %v760_v30 }
 0x1f7   : > { %v770_v41 = vrot.slane %v769_v21, 2 }
 0x1f8   : > { %v674_v31 = vmax.f32 %v642_v20, 0.0  ;;  %v749_v38 = vadd.f32 %v748_v23, %v718_v24  ;;  %v681_v3 = vmax.f32 %v649_v43, 0.0  ;;  %v740_v43 = vmul.f32 %v2227_v18, %v684_v22 }
 0x1f9   : > { %v618_v36 = vpop.permute.xlu1 %617  ;;  %v614_v26 = vpop.permute.xlu0 %613 }
 0x1fa   : > { %v730_v45 = vmul.f32 %v2229_v19, %v674_v31  ;;  %v750_v46 = vrot.slane %v749_v38, 4  ;;  %v656_v47 = vadd.f32 %v618_v36, %v472_v7  ;;  %v655_v53 = vadd.f32 %v614_v26, %v471_v39 }
 0x1fb   : > { %v737_v50 = vmul.f32 %v2225_v17, %v681_v3  ;;  %v763_v3 = vrot.slane %v762_v13, 1 }
 0x1fc   : > { %v776_v52 = vadd.f32 %v775_v40, %v730_v45  ;;  %v751_v5 = vadd.f32 %v750_v46, %v749_v38  ;;  %v688_v6 = vmax.f32 %v656_v47, 0.0  ;;  %v687_v20 = vmax.f32 %v655_v53, 0.0  ;;  %v474_v38 = vld [vmem:[#allocation5 + $0xf8] sm:$0xff] }
 0x1fd   : > { %v603_v62 = vpop.permute.xlu1 %602  ;;  %v569_v32 = vpop.permute.xlu0 %568  ;;  %v470_v40 = vld [vmem:[#allocation5 + $0xd8] sm:$0xff]  ;;  %v793_v49 = vadd.f32 %v792_v48, %v737_v50 }
 0x1fe   : > { %v777_v4 = vrot.slane %v776_v52, 4  ;;  %v653_v35 = vadd.f32 %v603_v62, %v469_v54  ;;  %v646_v8 = vadd.f32 %v569_v32, %v462_v55  ;;  %v752_v34 = vrot.slane %v751_v5, 2 }
 0x1ff   : > { %v744_v28 = vmul.f32 %v2227_v18, %v688_v6  ;;  %v743_v37 = vmul.f32 %v2223_v16, %v687_v20  ;;  %v771_v32 = vadd.f32 %v770_v41, %v769_v21  ;;  %v801_v18 = vadd.f32 %v740_v43, %v739_v42 }
 0x200   : > { %v778_v15 = vadd.f32 %v777_v4, %v776_v52  ;;  %v678_v23 = vmax.f32 %v646_v8, 0.0  ;;  %v685_v29 = vmax.f32 %v653_v35, 0.0  ;;  %v753_v54 = vadd.f32 %v752_v34, %v751_v5 }
 0x201   : > { %v622_v24 = vpop.permute.xlu1 %621  ;;  %v588_v25 = vpop.permute.xlu0 %587  ;;  %v810_v61 = vadd.f32 %v744_v28, %v743_v37  ;;  %v772_v20 = vrot.slane %v771_v32, 1  ;;  %v764_v21 = vadd.f32 %v763_v3, %v762_v13 }
 0x202   : > { %v657_v31 = vadd.f32 %v622_v24, %v473_v11  ;;  %v650_v7 = vadd.f32 %v588_v25, %v466_v12  ;;  %v734_v30 = vmul.f32 %v2229_v19, %v678_v23  ;;  %v779_v36 = vrot.slane %v778_v15, 2  ;;  %v1611_v25 = vld [vmem:[%s2494_s2] ss:$0 sm:$0xff] }
 0x203   : > { %v741_v55 = vmul.f32 %v2225_v17, %v685_v29  ;;  %v773_v28 = vadd.f32 %v772_v20, %v771_v32 }
 0x204   : > { %v689_v39 = vmax.f32 %v657_v31, 0.0  ;;  %v682_v26 = vmax.f32 %v650_v7, 0.0  ;;  %v785_v45 = vadd.f32 %v784_v27, %v734_v30  ;;  %v780_v59 = vadd.f32 %v779_v36, %v778_v15 }
 0x205   : > { %v626_v46 = vpop.permute.xlu1 %625  ;;  %v607_v47 = vpop.permute.xlu0 %606  ;;  %v802_v8 = vadd.f32 %v801_v18, %v741_v55  ;;  %v828_v42 = vadd.f32 %v1611_v25, %v773_v28 }
 0x206   : > { %v745_v44 = vmul.f32 %v2225_v17, %v689_v39  ;;  %v738_v52 = vmul.f32 %v2229_v19, %v682_v26  ;;  %v658_v53 = vadd.f32 %v626_v46, %v474_v38  ;;  %v786_v58 = vrot.slane %v785_v45, 4 }
 0x207   : > { %v654_v51 = vadd.f32 %v607_v47, %v470_v40  ;;  %v754_v17 = vrot.slane %v753_v54, 1  ;;  %v781_v12 = vrot.slane %v780_v59, 1  ;;  %v827_v38 = vadd.f32 %v1611_v25, %v764_v21 }
 0x208   : > { %v794_v62 = vadd.f32 %v793_v49, %v738_v52  ;;  %v690_v16 = vmax.f32 %v658_v53, 0.0  ;;  %v787_v33 = vadd.f32 %v786_v58, %v785_v45  ;;  %v811_v4 = vadd.f32 %v810_v61, %v745_v44 }
 0x209   : > { %v686_v63 = vmax.f32 %v654_v51, 0.0  ;;  %v755_v31 = vadd.f32 %v754_v17, %v753_v54  ;;  %v782_v7 = vadd.f32 %v781_v12, %v780_v59  ;;  %v842_v46 = vrot.slane %v827_v38, 7 }
 0x20a   : > { %v795_v6 = vrot.slane %v794_v62, 4  ;;  %v746_v35 = vmul.f32 %v2229_v19, %v690_v16  ;;  %v788_v11 = vrot.slane %v787_v33, 2  ;;  %v845_v55 = vrot.slane %v828_v42, 6 }
 0x20b   : > { %v742_v5 = vmul.f32 %v2229_v19, %v686_v63  ;;  %v826_v13 = vadd.f32 %v1611_v25, %v755_v31  ;;  %v829_v26 = vadd.f32 %v1611_v25, %v782_v7 }
 0x20c   : > { %v796_v14 = vadd.f32 %v795_v6, %v794_v62  ;;  %v812_v15 = vadd.f32 %v811_v4, %v746_v35  ;;  %v789_v48 = vadd.f32 %v788_v11, %v787_v33 }
 0x20d   : > { %v803_v22 = vadd.f32 %v802_v8, %v742_v5  ;;  %v844_v53 = vsel %vm843_vm0, %v842_v46, %v826_v13  ;;  %v848_v54 = vrot.slane %v829_v26, 5 }
 0x20e   : > { %v797_v23 = vrot.slane %v796_v14, 2  ;;  %v813_v24 = vrot.slane %v812_v15, 4  ;;  %v790_v27 = vrot.slane %v789_v48, 1  ;;  %v847_v16 = vsel %vm846_vm1, %v845_v55, %v844_v53 }
 0x20f   : > { %v804_v50 = vrot.slane %v803_v22, 4  ;;  %v850_v32 = vsel %vm849_vm2, %v848_v54, %v847_v16 }
 0x210   : > { %v798_v34 = vadd.f32 %v797_v23, %v796_v14  ;;  %v814_v19 = vadd.f32 %v813_v24, %v812_v15  ;;  %v791_v29 = vadd.f32 %v790_v27, %v789_v48 }
 0x211   : > { %v805_v30 = vadd.f32 %v804_v50, %v803_v22 }
 0x212   : > { %v799_v36 = vrot.slane %v798_v34, 1  ;;  %v815_v37 = vrot.slane %v814_v19, 2  ;;  %v830_v43 = vadd.f32 %v1611_v25, %v791_v29 }
 0x213   : > { %v806_v39 = vrot.slane %v805_v30, 2 }
 0x214   : > { %v800_v40 = vadd.f32 %v799_v36, %v798_v34  ;;  %v816_v41 = vadd.f32 %v815_v37, %v814_v19  ;;  %v851_v51 = vrot.slane %v830_v43, 4 }
 0x215   : > { %v807_v45 = vadd.f32 %v806_v39, %v805_v30 }
 0x216   : > { %v817_v47 = vrot.slane %v816_v41, 1  ;;  %v831_v49 = vadd.f32 %v1611_v25, %v800_v40  ;;  %v853_v33 = vsel %vm852_vm3, %v851_v51, %v850_v32 }
 0x217   : > { %v808_v44 = vrot.slane %v807_v45, 1 }
 0x218   : > { %v818_v52 = vadd.f32 %v817_v47, %v816_v41  ;;  %v854_v61 = vrot.slane %v831_v49, 3 }
 0x219   : > { %v809_v58 = vadd.f32 %v808_v44, %v807_v45 }
 0x21a   : > { %v833_v59 = vadd.f32 %v1611_v25, %v818_v52  ;;  %v856_v3 = vsel %vm855_vm4, %v854_v61, %v853_v33  ;;  %v956_v33 = vld [vmem:[#allocation2] sm:$0xff] }
 0x21b   : > { %v832_v62 = vadd.f32 %v1611_v25, %v809_v58 }
 0x21c   : > { %v860_v18 = vrot.slane %v833_v59, 1 }
 0x21d   : > { %v857_v63 = vrot.slane %v832_v62, 2 }
 0x21f   : > { %v859_v4 = vsel %vm858_vm5, %v857_v63, %v856_v3 }
 0x220   : > { %v862_v6 = vsel %vm861_vm6, %v860_v18, %v859_v4  ;;  %v958_v18 = vld [vmem:[#allocation2 + $0x10] sm:$0xff] }
 0x221   : > { %864 = vmax.xlane.f32.xlu0 %v862_v6 }
 0x2ae   : > { %v865_v35 = vpop.xlane.xlu0 %864 }
 0x2af   : > { %v867_v8 = vrot.slane %v865_v35, 1  ;;  %v868_v11 = vrot.slane %v865_v35, 2  ;;  %v869_v5 = vrot.slane %v865_v35, 3  ;;  %v870_v17 = vrot.slane %v865_v35, 4 }
 0x2b0   : > { %v871_v12 = vrot.slane %v865_v35, 5  ;;  %v872_v14 = vrot.slane %v865_v35, 6  ;;  %v882_v15 = vsub.f32 %v826_v13, %v865_v35  ;;  %v873_v20 = vrot.slane %v865_v35, 7 }
 0x2b1   : > { %v883_v48 = vsub.f32 %v827_v38, %v867_v8  ;;  %v884_v22 = vsub.f32 %v828_v42, %v868_v11  ;;  %v885_v21 = vsub.f32 %v829_v26, %v869_v5  ;;  %v886_v23 = vsub.f32 %v830_v43, %v870_v17  ;;  %v959_v8 = vld [vmem:[#allocation2 + $0x18] sm:$0xff]  ;;  %v957_v11 = vld [vmem:[#allocation2 + $0x8] sm:$0xff] }
 0x2b2   : > { %v890_v24 = vmul.f32 1.442695, %v882_v15  ;;  %v887_v25 = vsub.f32 %v831_v49, %v871_v12  ;;  %v888_v27 = vsub.f32 %v832_v62, %v872_v14  ;;  %v889_v34 = vsub.f32 %v833_v59, %v873_v20 }
 0x2b3   : > { %v892_v50 = vmul.f32 1.442695, %v883_v48  ;;  %v894_v31 = vmul.f32 1.442695, %v884_v22  ;;  %v896_v7 = vmul.f32 1.442695, %v885_v21 }
 0x2b4   : > { %1782 = vpow2.f32 %v890_v24  ;;  %v898_v19 = vmul.f32 1.442695, %v886_v23  ;;  %v900_v28 = vmul.f32 1.442695, %v887_v25  ;;  %v902_v29 = vmul.f32 1.442695, %v888_v27 }
 0x2b5   : > { %1784 = vpow2.f32 %v892_v50  ;;  %v904_v30 = vmul.f32 1.442695, %v889_v34  ;;  %v961_v22 = vld [vmem:[#allocation2 + $0x28] sm:$0xff]  ;;  %v960_v21 = vld [vmem:[#allocation2 + $0x20] sm:$0xff] }
 0x2b6   : > { %1786 = vpow2.f32 %v894_v31 }
 0x2b7   : > { %1788 = vpow2.f32 %v896_v7 }
 0x2b8   : > { %1790 = vpow2.f32 %v898_v19 }
 0x2b9   : > { %1792 = vpow2.f32 %v900_v28 }
 0x2ba   : > { %1794 = vpow2.f32 %v902_v29  ;;  %v962_v29 = vld [vmem:[#allocation2 + $0x30] sm:$0xff] }
 0x2bb   : > { %1796 = vpow2.f32 %v904_v30  ;;  %v964_v30 = vld [vmem:[#allocation2 + $0x40] sm:$0xff] }
 0x2be   : > { %v1783_v38 = vpop.eup %1782 }
 0x2bf   : > { %v1785_v36 = vpop.eup %1784 }
 0x2c0   : > { %v1787_v37 = vpop.eup %1786  ;;  %v914_v39 = vrot.slane %v1785_v36, 7 }
 0x2c1   : > { %v1789_v13 = vpop.eup %1788  ;;  %v916_v26 = vrot.slane %v1787_v37, 6 }
 0x2c2   : > { %v1791_v40 = vpop.eup %1790  ;;  %v915_v41 = vsel %vm843_vm0, %v914_v39, %v1783_v38  ;;  %v918_v42 = vrot.slane %v1789_v13, 5 }
 0x2c3   : > { %v1793_v43 = vpop.eup %1792  ;;  %v917_v45 = vsel %vm846_vm1, %v916_v26, %v915_v41  ;;  %v920_v46 = vrot.slane %v1791_v40, 4 }
 0x2c4   : > { %v1795_v47 = vpop.eup %1794  ;;  %v919_v49 = vsel %vm849_vm2, %v918_v42, %v917_v45  ;;  %v922_v44 = vrot.slane %v1793_v43, 3  ;;  %v966_v45 = vld [vmem:[#allocation2 + $0x50] sm:$0xff] }
 0x2c5   : > { %v1797_v52 = vpop.eup %1796  ;;  %v921_v53 = vsel %vm852_vm3, %v920_v46, %v919_v49  ;;  %v924_v54 = vrot.slane %v1795_v47, 2 }
 0x2c6   : > { %v923_v55 = vsel %vm855_vm4, %v922_v44, %v921_v53  ;;  %v926_v58 = vrot.slane %v1797_v52, 1 }
 0x2c7   : > { %v925_v51 = vsel %vm858_vm5, %v924_v54, %v923_v55 }
 0x2c8   : > { %v927_v59 = vsel %vm861_vm6, %v926_v58, %v925_v51  ;;  %v963_v51 = vld [vmem:[#allocation2 + $0x38] sm:$0xff] }
 0x2c9   : > { %929 = vadd.xlane.f32.xlu1 %v927_v59  ;;  %v969_v59 = vld [vmem:[#allocation2 + $0x68] sm:$0xff] }
 0x356   : > { %v930_v61 = vpop.xlane.xlu1 %929 }
 0x357   : > { %1798 = vrcp.f32 %v930_v61 }
 0x361   : > { %v1799_v62 = vpop.eup %1798 }
 0x362   : > { %v948_v16 = vmul.f32 %v1799_v62, %v1783_v38  ;;  %v933_v32 = vrot.slane %v1799_v62, 1  ;;  %v934_v3 = vrot.slane %v1799_v62, 2  ;;  %v935_v17 = vrot.slane %v1799_v62, 3 }
 0x363   : > { %v936_v12 = vrot.slane %v1799_v62, 4  ;;  %v937_v23 = vrot.slane %v1799_v62, 5  ;;  %v938_v24 = vrot.slane %v1799_v62, 6  ;;  %v939_v31 = vrot.slane %v1799_v62, 7 }
 0x364   : > { %v991_v63 = vrot.slane %v948_v16, %v2215_v2  ;;  %v949_v35 = vmul.f32 %v1785_v36, %v933_v32  ;;  %v950_v5 = vmul.f32 %v1787_v37, %v934_v3  ;;  %v951_v27 = vmul.f32 %v1789_v13, %v935_v17  ;;  %v968_v32 = vld [vmem:[#allocation2 + $0x60] sm:$0xff] }
 0x365   : > { %v952_v50 = vmul.f32 %v1791_v40, %v936_v12  ;;  %v953_v38 = vmul.f32 %v1793_v43, %v937_v23  ;;  %v954_v36 = vmul.f32 %v1795_v47, %v938_v24  ;;  %v2290_v39 = vmul.f32 %v1797_v52, %v939_v31  ;;  %v965_v40 = vld [vmem:[#allocation2 + $0x48] sm:$0xff]  ;;  %v978_v23 = vld [vmem:[#allocation2 + $0xb0] sm:$0xff] }
 0x366   : > { %v1022_v4 = vmul.f32 %v991_v63, %v958_v18  ;;  %v1020_v6 = vmul.f32 %v991_v63, %v956_v33  ;;  %v1023_v14 = vmul.f32 %v991_v63, %v959_v8  ;;  %v1021_v15 = vmul.f32 %v991_v63, %v957_v11  ;;  %v970_v18 = vld [vmem:[#allocation2 + $0x70] sm:$0xff]  ;;  %v972_v11 = vld [vmem:[#allocation2 + $0x80] sm:$0xff]  ;;  %v981_v31 = vld [vmem:[#allocation2 + $0xc8] sm:$0xff] }
 0x367   : > { %v995_v20 = vrot.slane %v949_v35, %v2215_v2  ;;  %v1539_v48 = vrot.slane %v949_v35, 7  ;;  %v999_v25 = vrot.slane %v950_v5, %v2215_v2  ;;  %v1541_v19 = vrot.slane %v950_v5, 6  ;;  %v974_v5 = vld [vmem:[#allocation2 + $0x90] sm:$0xff] }
 0x368   : > { %1056 = vadd.xlane.f32.xlu1 %v1022_v4  ;;  %1052 = vadd.xlane.f32.xlu0 %v1020_v6  ;;  %v1543_v37 = vrot.slane %v951_v27, 5  ;;  %v1545_v42 = vrot.slane %v952_v50, 4  ;;  %v1547_v49 = vrot.slane %v953_v38, 3  ;;  %v1549_v44 = vrot.slane %v954_v36, 2  ;;  %v967_v4 = vld [vmem:[#allocation2 + $0x58] sm:$0xff]  ;;  %v973_v6 = vld [vmem:[#allocation2 + $0x88] sm:$0xff] }
 0x369   : > { %v1025_v7 = vmul.f32 %v995_v20, %v961_v22  ;;  %v1024_v34 = vmul.f32 %v995_v20, %v960_v21  ;;  %v1540_v28 = vsel %vm843_vm0, %v1539_v48, %v948_v16  ;;  %v1026_v26 = vmul.f32 %v995_v20, %v962_v29  ;;  %v976_v21 = vld [vmem:[#allocation2 + $0xa0] sm:$0xff]  ;;  %v123_v29 = vld [vmem:[#allocation8 + $0x18] sm:$0xff] }
 0x36a   : > { %v1028_v41 = vmul.f32 %v999_v25, %v964_v30  ;;  %v1542_v13 = vsel %vm846_vm1, %v1541_v19, %v1540_v28  ;;  %v1551_v52 = vrot.slane %v2290_v39, 1  ;;  %v1029_v53 = vmul.f32 %v999_v25, %v965_v40  ;;  %v980_v19 = vld [vmem:[#allocation2 + $0xc0] sm:$0xff]  ;;  %v982_v28 = vld [vmem:[#allocation2 + $0xd0] sm:$0xff]  ;;  %v129_v30 = vld [vmem:[#allocation8 + $0x48] sm:$0xff] }
 0x36b   : > { %v1544_v46 = vsel %vm849_vm2, %v1543_v37, %v1542_v13  ;;  %v1030_v54 = vmul.f32 %v999_v25, %v966_v45  ;;  %v1003_v55 = vrot.slane %v951_v27, %v2215_v2  ;;  %v1027_v62 = vmul.f32 %v995_v20, %v963_v51  ;;  %v977_v20 = vld [vmem:[#allocation2 + $0xa8] sm:$0xff]  ;;  %v979_v13 = vld [vmem:[#allocation2 + $0xb8] sm:$0xff]  ;;  %v146_v51 = vld [vmem:[#allocation8 + $0xd0] sm:$0xff] }
 0x36c   : > { %1058 = vadd.xlane.f32.xlu1 %v1023_v14  ;;  %1054 = vadd.xlane.f32.xlu0 %v1021_v15  ;;  %v1546_v43 = vsel %vm852_vm3, %v1545_v42, %v1544_v46  ;;  %v1007_v3 = vrot.slane %v952_v50, %v2215_v2  ;;  %v1031_v35 = vmul.f32 %v999_v25, %v967_v4  ;;  %v971_v15 = vld [vmem:[#allocation2 + $0x78] sm:$0xff]  ;;  %v985_v40 = vld [vmem:[#allocation2 + $0xe8] sm:$0xff]  ;;  %v158_v4 = vld [vmem:[#allocation8 + $0x130] sm:$0xff] }
 0x36d   : > { %v1548_v47 = vsel %vm855_vm4, %v1547_v49, %v1546_v43  ;;  %v1033_v16 = vmul.f32 %v1003_v55, %v969_v59  ;;  %v1032_v33 = vmul.f32 %v1003_v55, %v968_v32  ;;  %v1034_v63 = vmul.f32 %v1003_v55, %v970_v18  ;;  %v975_v50 = vld [vmem:[#allocation2 + $0x98] sm:$0xff]  ;;  %v141_v49 = vld [vmem:[#allocation8 + $0xa8] sm:$0xff]  ;;  %v134_v43 = vld [vmem:[#allocation8 + $0x70] sm:$0xff] }
 0x36e   : > { %v1550_v58 = vsel %vm858_vm5, %v1549_v44, %v1548_v47  ;;  %v1037_v8 = vmul.f32 %v1007_v3, %v973_v6  ;;  %v1036_v17 = vmul.f32 %v1007_v3, %v972_v11  ;;  %v1038_v12 = vmul.f32 %v1007_v3, %v974_v5  ;;  %v135_v46 = vld [vmem:[#allocation8 + $0x78] sm:$0xff]  ;;  %v152_v32 = vld [vmem:[#allocation8 + $0x100] sm:$0xff]  ;;  %v125_v11 = vld [vmem:[#allocation8 + $0x28] sm:$0xff] }
 0x36f   : > { %v2300_v61 = vsel %vm861_vm6, %v1551_v52, %v1550_v58  ;;  %v1011_v14 = vrot.slane %v953_v38, %v2215_v2  ;;  %v1035_v48 = vmul.f32 %v1003_v55, %v971_v15  ;;  %v1015_v27 = vrot.slane %v954_v36, %v2215_v2  ;;  %v122_v38 = vld [vmem:[#allocation8 + $0x10] sm:$0xff]  ;;  %v128_v36 = vld [vmem:[#allocation8 + $0x40] sm:$0xff]  ;;  %v983_v18 = vld [vmem:[#allocation2 + $0xd8] sm:$0xff] }
 0x370   : > { %1062 = vadd.xlane.f32.xlu0 %v1025_v7  ;;  %1060 = vadd.xlane.f32.xlu1 %v1024_v34  ;;  %v1039_v7 = vmul.f32 %v1007_v3, %v975_v50  ;;  %v1653_v42 = vpack.c.bf16 %v129_v30, %v123_v29  ;;  %v1655_v45 = vpack.c.bf16 %v128_v36, %v122_v38  ;;  %v986_v55 = vld [vmem:[#allocation2 + $0xf0] sm:$0xff]  ;;  %v165_v3 = vld [vmem:[#allocation8 + $0x168] sm:$0xff]  ;;  %v131_v5 = vld [vmem:[#allocation8 + $0x58] sm:$0xff] }
 0x371   : > { %v1041_v22 = vmul.f32 %v1011_v14, %v977_v20  ;;  %v1040_v24 = vmul.f32 %v1011_v14, %v976_v21  ;;  %v1042_v25 = vmul.f32 %v1011_v14, %v978_v23  ;;  %v1045_v34 = vmul.f32 %v1015_v27, %v981_v31  ;;  %v124_v15 = vld [vmem:[#allocation8 + $0x20] sm:$0xff]  ;;  %v130_v20 = vld [vmem:[#allocation8 + $0x50] sm:$0xff]  ;;  %v177_v23 = vld [vmem:[#allocation8 + $0x1c8] sm:$0xff] }
 0x372   : > { %v1044_v37 = vmul.f32 %v1015_v27, %v980_v19  ;;  %1654 = vmatprep.subr.bf16.mxu1 %v1653_v42  ;;  %v1043_v44 = vmul.f32 %v1011_v14, %v979_v13  ;;  %v1657_v52 = vpack.c.bf16 %v141_v49, %v135_v46  ;;  %v1047_v6 = vmul.f32 %v1015_v27, %v983_v18  ;;  %v137_v31 = vld [vmem:[#allocation8 + $0x88] sm:$0xff]  ;;  %v136_v29 = vld [vmem:[#allocation8 + $0x80] sm:$0xff]  ;;  %v142_v30 = vld [vmem:[#allocation8 + $0xb0] sm:$0xff] }
 0x373   : > { %1656 = vmatpush1.bf16.msra.mxu1 %v1655_v45  ;;  %v1685_v14 = vpack.c.bf16 %v131_v5, %v125_v11  ;;  %v1687_v21 = vpack.c.bf16 %v130_v20, %v124_v15  ;;  %v1519_v19 = vstv %s2006_s21  ;;  %v183_v38 = vld [vmem:[#allocation8 + $0x1f8] sm:$0xff]  ;;  %v188_v42 = vld [vmem:[#allocation8 + $0x220] sm:$0xff]  ;;  %v213_v18 = vld [vmem:[#allocation8 + $0x2e8] sm:$0xff]  ;;  %s117_s21 = sadd.s32 1, %s2006_s21  }
 0x374   : > { %1064 = vadd.xlane.f32.xlu0 %v1026_v26  ;;  %1068 = vadd.xlane.f32.xlu1 %v1028_v41  ;;  %v1046_v26 = vmul.f32 %v1015_v27, %v982_v28  ;;  %v1019_v41 = vrot.slane %v2290_v39, %v2215_v2  ;;  %v147_v2 = vld [vmem:[#allocation8 + $0xd8] sm:$0xff]  ;;  %v153_v39 = vld [vmem:[#allocation8 + $0x108] sm:$0xff]  ;;  %v148_v49 = vld [vmem:[#allocation8 + $0xe0] sm:$0xff]  ;;  %p114_p12 = scmp.ge.s32.totalorder %s117_s21, 7  }
 0x375   : > { %1658 = vmatprep.subr.bf16.mxu1 %v1657_v52  ;;  %1686 = vmatprep.subr.bf16.mxu0 %v1685_v14  ;;  %v155_v45 = vld [vmem:[#allocation8 + $0x118] sm:$0xff]  ;;  %v172_v11 = vld [vmem:[#allocation8 + $0x1a0] sm:$0xff]  ;;  %v178_v5 = vld [vmem:[#allocation8 + $0x1d0] sm:$0xff]  ;;  %s2021_s17 = smov (%p114_p12), [#allocation11]   ;;  %s2022_s20 = smov (%p114_p12), [#allocation12]  }
 0x376   : > { %v1049_v47 = vmul.f32 %v1019_v41, %v985_v40  ;;  %1688 = vmatpush1.bf16.msra.mxu0 %v1687_v21  ;;  %v149_v40 = vld [vmem:[#allocation8 + $0xe8] sm:$0xff]  ;;  %v1324_v15 = vld [vmem:[#allocation10] sm:$0xff]  ;;  %s1562_s19 = sshll.u32 (%p114_p12), %s2021_s17, 4  ;;  %s1574_s8 = sshll.u32 (%p114_p12), %s2022_s20, 4  ;;  %s1563_s19 = int_to_ptr.vmem [resolvable:$true] %s1562_s19  ;;  %s2455_s8 = int_to_ptr.vmem [resolvable:$true] %s1574_s8 }
 0x377   : > { %v1693_v46 = vpack.c.bf16 %v155_v45, %v149_v40  ;;  %v1329_v14 = vld [vmem:[#allocation10 + $0x28] sm:$0xff]  ;;  %v1328_v20 = vld [vmem:[#allocation10 + $0x20] sm:$0xff]  ;;  %s1930_s9 = scalar_lea.vmem (%p114_p12), %s1563_s19, 896  ;;  %p1935_p0 = scmp.lt.s32.totalorder (%p114_p12), %s1563_s19, %s1563_s19 }
 0x378   : > { %1070 = vadd.xlane.f32.xlu0 %v1029_v53  ;;  %1072 = vadd.xlane.f32.xlu1 %v1030_v54  ;;  %v140_v53 = vld [vmem:[#allocation8 + $0xa0] sm:$0xff]  ;;  %v185_v21 = vld [vmem:[#allocation8 + $0x208] sm:$0xff]  ;;  %p1931_p13 = scmp.ne.s32.totalorder (%p114_p12), %s1563_s19, %s1930_s9  ;;  %p1936_p1 = scmp.lt.s32.totalorder (%p114_p12), %s1930_s9, %s1930_s9 }
 0x379   : > { %v984_v54 = vld [vmem:[#allocation2 + $0xe0] sm:$0xff]  ;;  %v1659_v58 = vpack.c.bf16 %v140_v53, %v134_v43  ;;  %v154_v43 = vld [vmem:[#allocation8 + $0x110] sm:$0xff]  ;;  %v201_v53 = vld [vmem:[#allocation8 + $0x288] sm:$0xff] }
 0x37a   : > { %v1048_v59 = vmul.f32 %v1019_v41, %v984_v54  ;;  %v1695_v52 = vpack.c.bf16 %v154_v43, %v148_v49  ;;  %v194_v54 = vld [vmem:[#allocation8 + $0x250] sm:$0xff]  ;;  %v209_v45 = vld [vmem:[#allocation8 + $0x2c8] sm:$0xff]  ;;  %v208_v49 = vld [vmem:[#allocation8 + $0x2c0] sm:$0xff]  ;;  %p1937_p2 = por (%p114_p12), %p1936_p1, %p1935_p0 }
 0x37b   : > { %1660 = vmatpush1.bf16.msra.mxu1 %v1659_v58  ;;  %v214_v43 = vld [vmem:[#allocation8 + $0x2f0] sm:$0xff] }
 0x37c   : > { %1066 = vadd.xlane.f32.xlu0 %v1027_v62  ;;  %1078 = vadd.xlane.f32.xlu1 %v1033_v16  ;;  %v1050_v62 = vmul.f32 %v1019_v41, %v986_v55  ;;  %v1661_v16 = vpack.c.bf16 %v153_v39, %v147_v2  ;;  %v200_v55 = vld [vmem:[#allocation8 + $0x280] sm:$0xff]  ;;  %v161_v39 = vld [vmem:[#allocation8 + $0x148] sm:$0xff]  ;;  %p1938_p3 = pnand (%p114_p12), %p1937_p2, %p1931_p13 }
 0x37d   : > { %v1679_v2 = vpack.c.bf16 %v200_v55, %v194_v54 }
 0x37e   : > { %1662 = vmatprep.subr.bf16.mxu1 %v1661_v16  ;;  %v166_v16 = vld [vmem:[#allocation8 + $0x170] sm:$0xff] }
 0x380   : > { %1076 = vadd.xlane.f32.xlu0 %v1032_v33  ;;  %1080 = vadd.xlane.f32.xlu1 %v1034_v63  ;;  %v1663_v33 = vpack.c.bf16 %v152_v32, %v146_v51  ;;  %v159_v63 = vld [vmem:[#allocation8 + $0x138] sm:$0xff] }
 0x381   : > { %v167_v51 = vld [vmem:[#allocation8 + $0x178] sm:$0xff] }
 0x382   : > { %1664 = vmatpush1.bf16.msra.mxu1 %v1663_v33  ;;  %v207_v32 = vld [vmem:[#allocation8 + $0x2b8] sm:$0xff]  ;;  %v206_v33 = vld [vmem:[#allocation8 + $0x2b0] sm:$0xff] }
 0x384   : > { %1074 = vadd.xlane.f32.xlu0 %v1031_v35  ;;  %1086 = vadd.xlane.f32.xlu1 %v1037_v8  ;;  %v1665_v35 = vpack.c.bf16 %v165_v3, %v159_v63  ;;  %v164_v8 = vld [vmem:[#allocation8 + $0x160] sm:$0xff]  ;;  %v1681_v3 = vpack.c.bf16 %v213_v18, %v207_v32 }
 0x385   : > { %v212_v63 = vld [vmem:[#allocation8 + $0x2e0] sm:$0xff] }
 0x386   : > { %1666 = vmatprep.subr.bf16.mxu1 %v1665_v35  ;;  %v179_v35 = vld [vmem:[#allocation8 + $0x1d8] sm:$0xff] }
 0x388   : > { %1084 = vadd.xlane.f32.xlu0 %v1036_v17  ;;  %1088 = vadd.xlane.f32.xlu1 %v1038_v12  ;;  %v987_v17 = vld [vmem:[#allocation2 + $0xf8] sm:$0xff]  ;;  %v1667_v12 = vpack.c.bf16 %v164_v8, %v158_v4  ;;  %v1683_v4 = vpack.c.bf16 %v212_v63, %v206_v33  ;;  %v1609_v33 = vld [vmem:[%s2499_s7] ss:$0 sm:$0xff] }
 0x38a   : > { %1668 = vmatpush1.bf16.msra.mxu1 %v1667_v12  ;;  %v1703_v12 = vpack.c.bf16 %v178_v5, %v172_v11  ;;  %v1149_v11 = vand.u32 127, %v475_v56 }
 0x38c   : > { %1082 = vadd.xlane.f32.xlu0 %v1035_v48  ;;  %1094 = vadd.xlane.f32.xlu1 %v1041_v22  ;;  %v171_v48 = vld [vmem:[#allocation8 + $0x198] sm:$0xff]  ;;  %v1051_v22 = vmul.f32 %v1019_v41, %v987_v17  ;;  %v182_v41 = vld [vmem:[#allocation8 + $0x1f0] sm:$0xff]  ;;  %v1325_v17 = vld [vmem:[#allocation10 + $0x8] sm:$0xff]  ;;  %v1154_v5 = vadd.s32 4294967288, %v1149_v11 }
 0x38d   : > { %v1669_v27 = vpack.c.bf16 %v177_v23, %v171_v48  ;;  %v1675_v13 = vpack.c.bf16 %v188_v42, %v182_v41  ;;  %v1717_v48 = vpack.c.bf16 %v1329_v14, %v1325_v17  ;;  %v191_v23 = vld [vmem:[#allocation8 + $0x238] sm:$0xff]  ;;  %v202_v41 = vld [vmem:[#allocation8 + $0x290] sm:$0xff] }
 0x38e   : > { %v1327_v42 = vld [vmem:[#allocation10 + $0x18] sm:$0xff]  ;;  %v2339_v14 = vsub.s32 %v1154_v5, %v2208_v57 }
 0x38f   : > { %1670 = vmatprep.subr.bf16.mxu1 %v1669_v27  ;;  %v190_v27 = vld [vmem:[#allocation8 + $0x230] sm:$0xff] }
 0x390   : > { %1092 = vadd.xlane.f32.xlu0 %v1040_v24  ;;  %1096 = vadd.xlane.f32.xlu1 %v1042_v25  ;;  %v170_v24 = vld [vmem:[#allocation8 + $0x190] sm:$0xff]  ;;  %v176_v25 = vld [vmem:[#allocation8 + $0x1c0] sm:$0xff] }
 0x391   : > { %v1671_v50 = vpack.c.bf16 %v176_v25, %v170_v24  ;;  %v1705_v24 = vpack.c.bf16 %v191_v23, %v185_v21  ;;  %v184_v25 = vld [vmem:[#allocation8 + $0x200] sm:$0xff] }
 0x393   : > { %1672 = vmatpush1.bf16.msra.mxu1 %v1671_v50  ;;  %v1333_v50 = vld [vmem:[#allocation10 + $0x48] sm:$0xff] }
 0x394   : > { %1090 = vadd.xlane.f32.xlu0 %v1039_v7  ;;  %1102 = vadd.xlane.f32.xlu1 %v1045_v34  ;;  %v143_v7 = vld [vmem:[#allocation8 + $0xb8] sm:$0xff]  ;;  %v1518_v34 = vld [vmem:[%s2496_s4] sm:$0xff] }
 0x395   : > { %v1689_v28 = vpack.c.bf16 %v143_v7, %v137_v31  ;;  %vm1520_vm7 = vcmp.gt.s32.totalorder %v1518_v34, %v1519_v19  ;;  %v1707_v31 = vpack.c.bf16 %v190_v27, %v184_v25  ;;  %v1337_v7 = vld [vmem:[#allocation10 + $0x68] sm:$0xff]  ;;  %v1332_v34 = vld [vmem:[#allocation10 + $0x40] sm:$0xff] }
 0x396   : > { %v1336_v19 = vld [vmem:[#allocation10 + $0x60] sm:$0xff] }
 0x397   : > { %1690 = vmatprep.subr.bf16.mxu0 %v1689_v28  ;;  %v1721_v28 = vpack.c.bf16 %v1337_v7, %v1333_v50 }
 0x398   : > { %1100 = vadd.xlane.f32.xlu0 %v1044_v37  ;;  %1104 = vadd.xlane.f32.xlu1 %v1046_v26  ;;  %v1691_v37 = vpack.c.bf16 %v142_v30, %v136_v29  ;;  %v189_v26 = vld [vmem:[#allocation8 + $0x228] sm:$0xff]  ;;  %v1723_v29 = vpack.c.bf16 %v1336_v19, %v1332_v34 }
 0x399   : > { %v1673_v36 = vpack.c.bf16 %v189_v26, %v183_v38  ;;  %v197_v30 = vld [vmem:[#allocation8 + $0x268] sm:$0xff]  ;;  %v203_v38 = vld [vmem:[#allocation8 + $0x298] sm:$0xff] }
 0x39a   : > { %1692 = vmatpush1.bf16.msra.mxu0 %v1691_v37  ;;  %v196_v37 = vld [vmem:[#allocation8 + $0x260] sm:$0xff]  ;;  %v1709_v26 = vpack.c.bf16 %v203_v38, %v197_v30 }
 0x39b   : > { %1674 = vmatprep.subr.bf16.mxu1 %v1673_v36  ;;  %1694 = vmatprep.subr.bf16.mxu0 %v1693_v46  ;;  %v1331_v36 = vld [vmem:[#allocation10 + $0x38] sm:$0xff] }
 0x39c   : > { %1098 = vadd.xlane.f32.xlu0 %v1043_v44  ;;  %1110 = vadd.xlane.f32.xlu1 %v1049_v47  ;;  %v195_v44 = vld [vmem:[#allocation8 + $0x258] sm:$0xff]  ;;  %v1521_v47 = vsel %vm1520_vm7, 1, %v2020_v10  ;;  %v1725_v40 = vpack.c.bf16 %v1331_v36, %v1327_v42 }
 0x39d   : > { %1676 = vmatpush1.bf16.msra.mxu1 %v1675_v13  ;;  %v1677_v58 = vpack.c.bf16 %v201_v53, %v195_v44  ;;  %v1711_v13 = vpack.c.bf16 %v202_v41, %v196_v37  ;;  %v215_v46 = vld [vmem:[#allocation8 + $0x2f8] sm:$0xff] }
 0x39e   : > { %1696 = vmatpush1.bf16.msra.mxu0 %v1695_v52  ;;  %v1713_v44 = vpack.c.bf16 %v215_v46, %v209_v45 }
 0x39f   : > { %1678 = vmatprep.subr.bf16.mxu1 %v1677_v58 }
 0x3a0   : > { %1108 = vadd.xlane.f32.xlu0 %v1048_v59  ;;  %1112 = vadd.xlane.f32.xlu1 %v1050_v62  ;;  %v1697_v59 = vpack.c.bf16 %v167_v51, %v161_v39  ;;  %v160_v62 = vld [vmem:[#allocation8 + $0x140] sm:$0xff] }
 0x3a1   : > { %1680 = vmatpush1.bf16.msra.mxu1 %v1679_v2  ;;  %v1699_v10 = vpack.c.bf16 %v166_v16, %v160_v62 }
 0x3a2   : > { %1698 = vmatprep.subr.bf16.mxu0 %v1697_v59  ;;  %1682 = vmatprep.subr.bf16.mxu1 %v1681_v3 }
 0x3a3   : > { %1700 = vmatpush1.bf16.msra.mxu0 %v1699_v10 }
 0x3a4   : > { %1106 = vadd.xlane.f32.xlu0 %v1047_v6  ;;  %v173_v6 = vld [vmem:[#allocation8 + $0x1a8] sm:$0xff] }
 0x3a5   : > { %v1701_v8 = vpack.c.bf16 %v179_v35, %v173_v6  ;;  %1684 = vmatpush1.bf16.msra.mxu1 %v1683_v4  ;;  %v436_v4 = vadd.f32 %v1609_v33, %v2211_v60  ;;  %v2344_v60 = vsub.s32 %v1149_v11, %v2208_v57 }
 0x3a6   : > { %1718 = vmatprep.subr.bf16.mxu1 %v1717_v48  ;;  %v1161_v48 = vadd.s32 4294967280, %v1149_v11 }
 0x3a7   : > { %1702 = vmatprep.subr.bf16.mxu0 %v1701_v8  ;;  %v1610_v8 = vmul.f32 -1.442695, %v436_v4 }
 0x3a8   : > { %1114 = vadd.xlane.f32.xlu0 %v1051_v22  ;;  %v1719_v22 = vpack.c.bf16 %v1328_v20, %v1324_v15  ;;  %1704 = vmatpush1.bf16.msra.mxu0 %v1703_v12 }
 0x3a9   : > { %352 = vmatmul.mubr.f32.vlgmr.msra.gmra.mrb[0].mxu1 %v2002_v0  ;;  %1706 = vmatprep.subr.bf16.mxu0 %v1705_v24  ;;  %1800 = vpow2.f32 %v1610_v8  ;;  %v2350_v24 = vsub.s32 %v1161_v48, %v2208_v57 }
 0x3aa   : > { %1720 = vmatpush1.bf16.msra.mxu1 %v1719_v22  ;;  %1408 = vmatprep.mubr.f32.mxu1 %v2019_v9  ;;  %v1168_v22 = vadd.s32 4294967272, %v1149_v11 }
 0x3ab   : > { %1722 = vmatprep.subr.bf16.mxu1 %v1721_v28 }
 0x3ac   : > { %1708 = vmatpush1.bf16.msra.mxu0 %v1707_v31  ;;  %v2355_v31 = vsub.s32 %v1168_v22, %v2208_v57 }
 0x3ad   : > { %1710 = vmatprep.subr.bf16.mxu0 %v1709_v26 }
 0x3ae   : > { %1724 = vmatpush1.bf16.msra.mxu1 %v1723_v29 }
 0x3af   : > { %1726 = vmatprep.subr.bf16.mxu1 %v1725_v40 }
 0x3b0   : > { %1712 = vmatpush1.bf16.msra.mxu0 %v1711_v13 }
 0x3b1   : > { %1523 = vperm.xlu1 %1781, %v1521_v47   ;;  %v1715_v47 = vpack.c.bf16 %v214_v43, %v208_v49  ;;  %1714 = vmatprep.subr.bf16.mxu0 %v1713_v44 }
 0x3b3   : > { %v1801_v27 = vpop.eup %1800 }
 0x3b4   : > { %1716 = vmatpush1.bf16.msra.mxu0 %v1715_v47  ;;  %v440_v37 = vadd.f32 1.0, %v1801_v27 }
 0x3b6   : > { %1802 = vrcp.f32 %v440_v37  ;;  %v1326_v37 = vld [vmem:[#allocation10 + $0x10] sm:$0xff] }
 0x3b7   : > { %423 = vmatmul.mubr.f32.vlgmr.msra.gmra.mrb[2].mxu0 %v2002_v0 }
 0x3f5   : > { %v1057_v52 = vpop.xlane.xlu1 %1056  ;;  %v1053_v53 = vpop.xlane.xlu0 %1052 }
 0x3f6   : > { %v1153_v25 = vrot.slane %v1053_v53, %v2344_v60  ;;  %v1165_v28 = vrot.slane %v1057_v52, %v2350_v24 }
 0x3f9   : > { %v2315_v54 = vpop.xlane.xlu1 %1058  ;;  %v1055_v55 = vpop.xlane.xlu0 %1054 }
 0x3fa   : > { %v1158_v21 = vrot.slane %v1055_v55, %v2339_v14  ;;  %v1172_v13 = vrot.slane %v2315_v54, %v2355_v31 }
 0x3fc   : > { %v1160_v7 = vsel %vm1159_vm8, %v1158_v21, %v1153_v25 }
 0x3fd   : > { %v1063_v58 = vpop.xlane.xlu0 %1062  ;;  %v1061_v2 = vpop.xlane.xlu1 %1060  ;;  %v1167_v57 = vsel %vm1166_vm9, %v1165_v28, %v1160_v7 }
 0x3fe   : > { %v1182_v29 = vrot.slane %v1063_v58, %v2339_v14  ;;  %v1178_v30 = vrot.slane %v1061_v2, %v2344_v60  ;;  %v1174_v52 = vsel %vm1173_vm10, %v1172_v13, %v1167_v57  ;;  %v1803_v28 = vpop.eup %1802 }
 0x400   : > { %v1183_v46 = vsel %vm1159_vm8, %v1182_v29, %v1178_v30 }
 0x401   : > { %v1065_v39 = vpop.xlane.xlu0 %1064  ;;  %v1069_v51 = vpop.xlane.xlu1 %1068 }
 0x402   : > { %v1197_v38 = vrot.slane %v1069_v51, %v2344_v60  ;;  %v1187_v26 = vrot.slane %v1065_v39, %v2350_v24 }
 0x404   : > { %v1188_v44 = vsel %vm1166_vm9, %v1187_v26, %v1183_v46  ;;  %v1330_v26 = vld [vmem:[#allocation10 + $0x30] sm:$0xff] }
 0x405   : > { %v1071_v59 = vpop.xlane.xlu0 %1070  ;;  %v1073_v62 = vpop.xlane.xlu1 %1072  ;;  %v1727_v46 = vpack.c.bf16 %v1330_v26, %v1326_v37 }
 0x406   : > { %v1201_v50 = vrot.slane %v1071_v59, %v2339_v14  ;;  %v1206_v41 = vrot.slane %v1073_v62, %v2350_v24 }
 0x408   : > { %v1202_v42 = vsel %vm1159_vm8, %v1201_v50, %v1197_v38 }
 0x409   : > { %v1067_v16 = vpop.xlane.xlu0 %1066  ;;  %v2317_v32 = vpop.xlane.xlu1 %1078  ;;  %v1207_v47 = vsel %vm1166_vm9, %v1206_v41, %v1202_v42  ;;  %v1335_v42 = vld [vmem:[#allocation10 + $0x58] sm:$0xff] }
 0x40a   : > { %v1192_v36 = vrot.slane %v1067_v16, %v2355_v31  ;;  %v1220_v54 = vrot.slane %v2317_v32, %v2339_v14 }
 0x40c   : > { %v1193_v53 = vsel %vm1173_vm10, %v1192_v36, %v1188_v44  ;;  %v1339_v36 = vld [vmem:[#allocation10 + $0x78] sm:$0xff]  ;;  %v1338_v44 = vld [vmem:[#allocation10 + $0x70] sm:$0xff] }
 0x40d   : > { %v2319_v10 = vpop.xlane.xlu0 %1076  ;;  %v2321_v18 = vpop.xlane.xlu1 %1080 }
 0x40e   : > { %v1216_v49 = vrot.slane %v2319_v10, %v2344_v60  ;;  %v1225_v2 = vrot.slane %v2321_v18, %v2350_v24 }
 0x410   : > { %v1221_v32 = vsel %vm1159_vm8, %v1220_v54, %v1216_v49  ;;  %v1320_v54 = vld [vmem:[%s1319_s18] sm:$0xff] }
 0x411   : > { %v2326_v63 = vpop.xlane.xlu0 %1074  ;;  %v2328_v3 = vpop.xlane.xlu1 %1086 }
 0x412   : > { %v1239_v55 = vrot.slane %v2328_v3, %v2339_v14  ;;  %v1211_v39 = vrot.slane %v2326_v63, %v2355_v31  ;;  %v1308_v63 = vsel %vm843_vm0, %v1193_v53, %v1174_v52 }
 0x415   : > { %v1085_v6 = vpop.xlane.xlu0 %1084  ;;  %v2331_v35 = vpop.xlane.xlu1 %1088 }
 0x416   : > { %v1235_v43 = vrot.slane %v1085_v6, %v2344_v60  ;;  %v1244_v51 = vrot.slane %v2331_v35, %v2350_v24 }
 0x418   : > { %v1240_v10 = vsel %vm1159_vm8, %v1239_v55, %v1235_v43  ;;  %v1729_v43 = vpack.c.bf16 %v1339_v36, %v1335_v42  ;;  %v1321_v55 = vld [vmem:[%s1319_s18 + $0x8] sm:$0xff] }
 0x419   : > { %v2334_v17 = vpop.xlane.xlu0 %1082  ;;  %v2336_v12 = vpop.xlane.xlu1 %1094 }
 0x41a   : > { %v1230_v33 = vrot.slane %v2334_v17, %v2355_v31  ;;  %v1258_v18 = vrot.slane %v2336_v12, %v2339_v14  ;;  %v1226_v17 = vsel %vm1166_vm9, %v1225_v2, %v1221_v32  ;;  %v1212_v12 = vsel %vm1173_vm10, %v1211_v39, %v1207_v47 }
 0x41b   : > { %v1309_v7 = vsel %vm846_vm1, %v1212_v12, %v1308_v63 }
 0x41c   : > { %v1231_v21 = vsel %vm1173_vm10, %v1230_v33, %v1226_v17 }
 0x41d   : > { %v1093_v15 = vpop.xlane.xlu0 %1092  ;;  %v2341_v20 = vpop.xlane.xlu1 %1096  ;;  %v1310_v29 = vsel %vm849_vm2, %v1231_v21, %v1309_v7 }
 0x41e   : > { %v1254_v58 = vrot.slane %v1093_v15, %v2344_v60  ;;  %v1263_v3 = vrot.slane %v2341_v20, %v2350_v24  ;;  %v1245_v15 = vsel %vm1166_vm9, %v1244_v51, %v1240_v10 }
 0x420   : > { %v1259_v35 = vsel %vm1159_vm8, %v1258_v18, %v1254_v58 }
 0x421   : > { %v2347_v56 = vpop.xlane.xlu0 %1090  ;;  %v1103_v23 = vpop.xlane.xlu1 %1102 }
 0x422   : > { %v1249_v4 = vrot.slane %v2347_v56, %v2355_v31  ;;  %v1277_v6 = vrot.slane %v1103_v23, %v2339_v14 }
 0x424   : > { %v1250_v25 = vsel %vm1173_vm10, %v1249_v4, %v1245_v15 }
 0x425   : > { %v1101_v34 = vpop.xlane.xlu0 %1100  ;;  %v1105_v19 = vpop.xlane.xlu1 %1104  ;;  %v1311_v38 = vsel %vm852_vm3, %v1250_v25, %v1310_v29 }
 0x426   : > { %v1273_v59 = vrot.slane %v1101_v34, %v2344_v60  ;;  %v1282_v8 = vrot.slane %v1105_v19, %v2350_v24 }
 0x428   : > { %v1278_v20 = vsel %vm1159_vm8, %v1277_v6, %v1273_v59  ;;  %v1322_v59 = vld [vmem:[%s1319_s18 + $0x10] sm:$0xff] }
 0x429   : > { %v1099_v40 = vpop.xlane.xlu0 %1098  ;;  %v1111_v45 = vpop.xlane.xlu1 %1110  ;;  %v1283_v34 = vsel %vm1166_vm9, %v1282_v8, %v1278_v20 }
 0x42a   : > { %v1268_v11 = vrot.slane %v1099_v40, %v2355_v31  ;;  %v1296_v56 = vrot.slane %v1111_v45, %v2339_v14 }
 0x42d   : > { %v1109_v62 = vpop.xlane.xlu0 %1108  ;;  %v1113_v16 = vpop.xlane.xlu1 %1112 }
 0x42e   : > { %v1292_v5 = vrot.slane %v1109_v62, %v2344_v60  ;;  %v1264_v60 = vsel %vm1166_vm9, %v1263_v3, %v1259_v35  ;;  %v1301_v27 = vrot.slane %v1113_v16, %v2350_v24  ;;  %v1323_v16 = vld [vmem:[%s1319_s18 + $0x18] sm:$0xff] }
 0x42f   : > { %v1269_v14 = vsel %vm1173_vm10, %v1268_v11, %v1264_v60 }
 0x430   : > { %v1297_v19 = vsel %vm1159_vm8, %v1296_v56, %v1292_v5  ;;  %v1312_v41 = vsel %vm855_vm4, %v1269_v14, %v1311_v38 }
 0x431   : > { %v1107_v48 = vpop.xlane.xlu0 %1106  ;;  %v2410_v22 = vpop.permute.xlu1 %1523  ;;  %v1302_v57 = vsel %vm1166_vm9, %v1301_v27, %v1297_v19 }
 0x432   : > { %v1287_v23 = vrot.slane %v1107_v48, %v2355_v31  ;;  %vm1525_vm11 = vcmp.eq.s32.totalorder %v2410_v22, 1 }
 0x433   : > { %v1554_v50 = vsel %vm1525_vm11, %v2300_v61, 0.0 }
 0x434   : > { %1556 = vst [vmem:[%s1555_s30] sm:$0xff] %v1554_v50  ;;  %v1288_v24 = vsel %vm1173_vm10, %v1287_v23, %v1283_v34 }
 0x435   : > { %v1115_v30 = vpop.xlane.xlu0 %1114  ;;  %v1313_v13 = vsel %vm858_vm5, %v1288_v24, %v1312_v41 }
 0x436   : > { %v1306_v61 = vrot.slane %v1115_v30, %v2355_v31  ;;  %v1334_v31 = vld [vmem:[#allocation10 + $0x50] sm:$0xff] }
 0x437   : > { %v1731_v47 = vpack.c.bf16 %v1338_v44, %v1334_v31 }
 0x438   : > { %v1307_v40 = vsel %vm1173_vm10, %v1306_v61, %v1302_v57 }
 0x439   : > { %v1314_v45 = vsel %vm861_vm6, %v1307_v40, %v1313_v13 }
 0x43a   : > { %v1316_v49 = vmul.f32 %v1803_v28, %v1314_v45 }
 0x43c   : > { %1614 = vmatmul.mubr.msk.f32.vlgmr.msra.gmra.mrb[0].mxu1 %vm1340_vm12, %v1316_v49 }
 0x43d   : > { %1728 = vmatpush1.bf16.msra.mxu1 %v1727_v46  ;;  %1479 = vmatprep.mubr.f32.mxu1 %v2019_v9 }
 0x43e   : > { %1730 = vmatprep.subr.bf16.mxu1 %v1729_v43 }
 0x441   : > { %1732 = vmatpush1.bf16.msra.mxu1 %v1731_v47 }
 0x444   : > { %1615 = vmatmul.mubr.msk.f32.vlgmr.msra.gmra.mrb[2].mxu1 %vm1340_vm12, %v1316_v49 }
 0x48a   : > { %v424_v52 = vpop.f32.mrb[2].mxu0 }
 0x48b   : > { %v426_v53 = vpop.f32.mrb[3].mxu0  ;;  %v1735_v10 = vadd.f32 %v1322_v59, %v424_v52 }
 0x48c   : > { %v1737_v9 = vadd.f32 %v1323_v16, %v426_v53 }
 0x50f   : > { %v1410_v58 = vpop.f32.mrb[0].mxu1 }
 0x510   : > { %v1486_v2 = vadd.f32 %v1410_v58, %v1320_v54  ;;  %v1412_v39 = vpop.f32.mrb[1].mxu1 }
 0x511   : > { %v1487_v51 = vadd.f32 %v1412_v39, %v1321_v55 }
 0x512   : > { %v1616_v62 = vmul.f32 -1.442695, %v1486_v2 }
 0x513   : > { %v1617_v32 = vmul.f32 -1.442695, %v1487_v51 }
 0x514   : > { %1804 = vpow2.f32 %v1616_v62 }
 0x515   : > { %1806 = vpow2.f32 %v1617_v32 }
 0x517   : > { %v1481_v33 = vpop.f32.mrb[2].mxu1 }
 0x518   : > { %v1736_v18 = vadd.f32 %v1735_v10, %v1481_v33  ;;  %v1483_v63 = vpop.f32.mrb[3].mxu1 }
 0x519   : > { %v1738_v3 = vadd.f32 %v1737_v9, %v1483_v63 }
 0x51b   : > { %v1618_v4 = vmul.f32 -1.442695, %v1738_v3 }
 0x51d   : > { %1808 = vpow2.f32 %v1618_v4 }
 0x51e   : > { %v1805_v6 = vpop.eup %1804  ;;  %1810 = vtanh.f32 %v1736_v18 }
 0x51f   : > { %v1807_v35 = vpop.eup %1806  ;;  %v1497_v8 = vadd.f32 1.0, %v1805_v6 }
 0x520   : > { %v1503_v11 = vadd.f32 1.0, %v1807_v35 }
 0x521   : > { %1812 = vrcp.f32 %v1497_v8 }
 0x522   : > { %1814 = vrcp.f32 %v1503_v11 }
 0x527   : > { %v1809_v5 = vpop.eup %1808 }
 0x528   : > { %v1811_v17 = vpop.eup %1810  ;;  %v1510_v48 = vadd.f32 1.0, %v1809_v5 }
 0x52a   : > { %1816 = vrcp.f32 %v1510_v48 }
 0x52b   : > { %v1813_v12 = vpop.eup %1812 }
 0x52c   : > { %v1815_v15 = vpop.eup %1814  ;;  %v1514_v20 = vmul.f32 %v1813_v12, %v1811_v17 }
 0x52d   : > { %v1513_v21 = vmul.f32 %v1998_v1, %v1815_v15 }
 0x52f   : > { %v1515_v56 = vadd.f32 %v1514_v20, %v1513_v21 }
 0x531   : > { %1818 = vtanh.f32 %v1515_v56  ;;  %v1527_v1 = vsel %vm1525_vm11, %v1515_v56, %v1998_v1  }
 0x534   : > { %v1817_v23 = vpop.eup %1816 }
 0x539   :  { %116 = sbr.rel (!%p114_p12) target bundleno = 94 (0x5e), region = 102 }
 0x53b   : > { %v1819_v60 = vpop.eup %1818 }
 0x53c   : > { %v1517_v25 = vmul.f32 %v1819_v60, %v1817_v23 }
 0x53e   : > { %v1526_v0 = vsel %vm1525_vm11, %v1517_v25, %v2002_v0  }
 0x53f   : > { %1530 = vst [vmem:[%s1529_s13] sm:$0xff] %v1526_v0 }
 0x540   :  { %1941 = shalt.err (!%p1938_p3)
}
 0x541   :  { %s1942_s14 = scalar_lea.hbm %s2503_s11, 896 }
 0x542   :  { %p1943_p4 = scmp.ne.s32.totalorder %s2503_s11, %s1942_s14  ;;  %p1946_p5 = scmp.lt.u32.totalorder %s1942_s14, %s2503_s11 }
 0x544   :  { %p1948_p6 = pnand %p1946_p5, %p1943_p4 }
 0x546   :  { %1951 = shalt.err (!%p1948_p6)
}
 0x547   :  { %1568 = dma.vmem_to_hbm [thread:$0]  %s1563_s19, 896, %s2503_s11, [#allocation4], %s2010_s15, %s2010_s15, %s2011_s16  }
 0x548   :  { %s1952_s25 = scalar_lea.vmem %s2455_s8, 896  ;;  %p1957_p8 = scmp.lt.s32.totalorder %s2455_s8, %s2455_s8 }
 0x549   :  { %p1953_p7 = scmp.ne.s32.totalorder %s2455_s8, %s1952_s25  ;;  %p1958_p9 = scmp.lt.s32.totalorder %s1952_s25, %s1952_s25 }
 0x54b   :  { %p1959_p10 = por %p1958_p9, %p1957_p8 }
 0x54d   :  { %p1960_p11 = pnand %p1959_p10, %p1953_p7 }
 0x54f   :  { %1963 = shalt.err (!%p1960_p11)
}
 0x550   :  { %s1964_s6 = scalar_lea.hbm %s2504_s12, 896 }
 0x551   :  { %p1965_p12 = scmp.ne.s32.totalorder %s2504_s12, %s1964_s6  ;;  %p1968_p13 = scmp.lt.u32.totalorder %s1964_s6, %s2504_s12 }
 0x553   :  { %p1970_p0 = pnand %p1968_p13, %p1965_p12 }
 0x555   :  { %1973 = shalt.err (!%p1970_p0)
}
 0x556   :  { %1580 = dma.vmem_to_hbm [thread:$0]  %s2455_s8, 896, %s2504_s12, [#allocation13], %s2010_s15, %s2010_s15, %s2011_s16  }
 0x557   :  { %1992 = dma.done.wait [#allocation4], 896  }
 0x558   :  { %1993 = vsyncadd [#allocation4], 4294966400 }
 0x559   :  { %1994 = dma.done.wait [#allocation13], 896  }
 0x55a   :  { %1995 = vsyncadd [#allocation13], 4294966400 }
 0x55b   :  { %1587 = vsyncpa [#allocation3], 1 }
 0x55c   :  { %1588 = vsyncpa [#allocation6], 1 }
 0x55d   :  { %1589 = vsyncpa [#allocation9], 1 }
 0x55e   :  { %1590 = vsyncpa [#allocation4], 1 }
 0x55f   :  { %1591 = vsyncpa [#allocation13], 1 }

</bundles_post_ra>
